<compile_context>
chip_gen: v7x
topology: tpu7x:2x2x1
jax: 0.10.0
libtpu: 0.0.40
codegen_flags: <defaults>
</compile_context>

<pallas_src>
import functools
import math

import jax
import jax.numpy as jnp
from jax.experimental import pallas as pl
from jax.experimental.pallas import tpu as pltpu


# ----------------------------------------------------------------------------
# Fused bidirectional GRU recurrence for one layer.
#   gi   : (2, 3, T, B, H)  bf16, precomputed x @ W_ih^T + (b_ih + [b_hr,b_hz,0])
#   w_hh : (2, H, 3H)       bf16, recurrent weights == weight_hh_l{k}.T
#   b_hn : (2, 1, H)        f32, candidate-gate recurrent bias
#   out  : (T, B, 2H) bf16 (fused layout)  OR  (2, T, B, H) bf16 (fallback)
# Grid = (2 directions, T // tc chunks); hidden state lives in VMEM scratch.
# ----------------------------------------------------------------------------
def _bigru_layer_kernel(gi_ref, w_ref, b_hn_ref, out_ref, h_ref, *, tc, hidden):
    d = pl.program_id(0)          # 0 = forward, 1 = backward
    c = pl.program_id(1)          # time-chunk index (blocks already dir-ordered)
    H = hidden

    @pl.when(c == 0)
    def _():                      # h0 = 0 (PyTorch default) at start of each pass
        h_ref[...] = jnp.zeros_like(h_ref)

    w = w_ref[...]                                            # (H, 3H) bf16
    # Hoisted once per chunk (JAX does not CSE broadcast_in_dim inside the loop).
    b_n = jnp.broadcast_to(b_hn_ref[...], h_ref.shape).astype(jnp.float32)

    def run_chunk(local_idx):
        # Fully unrolled with static indices -> static, aligned vector ld/st.
        # TODO(synk): for large B*H (>~8K elems) the unrolled live set can
        #             exceed the 64-vreg file; tile B inside the step there.
        h = h_ref[...]                                        # (B, H) f32
        for s in range(tc):
            j = local_idx(s)                                  # static Python int
            # One fused MXU matmul per step instead of three.
            gh = jnp.dot(h.astype(jnp.bfloat16), w,
                         preferred_element_type=jnp.float32)  # (B, 3H) f32
            gh_r = gh[:, 0:H]
            gh_z = gh[:, H:2 * H]
            gh_n = gh[:, 2 * H:3 * H]
            gi_r = gi_ref[0, j].astype(jnp.float32)
            gi_z = gi_ref[1, j].astype(jnp.float32)
            gi_n = gi_ref[2, j].astype(jnp.float32)
            r = jax.nn.sigmoid(gi_r + gh_r)                   # b_hr folded in gi
            z = jax.nn.sigmoid(gi_z + gh_z)                   # b_hz folded in gi
            n = jnp.tanh(gi_n + r * (gh_n + b_n))             # b_hn kept inside
            h = (1.0 - z) * n + z * h
            out_ref[j] = h.astype(out_ref.dtype)
        h_ref[...] = h

    @pl.when(d == 0)
    def _():                      # forward pass: local time runs 0 .. tc-1
        run_chunk(lambda s: s)

    @pl.when(d == 1)
    def _():                      # backward pass: local time runs tc-1 .. 0
        run_chunk(lambda s: tc - 1 - s)


def _pick_chunk(T, B, H, max_chunk=64, vmem_budget=24 << 20):
    """Largest tc that divides T and keeps the per-core working set in budget."""
    # Pipelined per-time-step bytes: GI block (3*B*H bf16) + out block (B*H bf16),
    # each double-buffered by the Pallas pipeline.
    per_step = 2 * (3 * B * H * 2) + 2 * (B * H * 2)
    # Resident: recurrent weights (H x 3H bf16, double-buffered), b_hn, h scratch.
    fixed = 2 * (H * 3 * H * 2) + 2 * (H * 4) + B * H * 4
    cap = max(1, (vmem_budget - fixed) // per_step)
    cap = int(min(cap, max_chunk, T))
    tc = 1
    for cand in range(1, cap + 1):
        if T % cand == 0:
            tc = cand
    # TODO(synk): for prime / ragged T this degenerates towards tc=1 (per-grid-
    #             step overhead dominates); pad T per direction or mask a ragged
    #             final chunk instead.
    return tc


def bigru_recurrent(gi, w_hh, b_hn):
    """gi: (2,3,T,B,H) bf16 -> (T,B,2H) bf16 bidirectional hidden states."""
    _, _, T, B, H = gi.shape
    tc = _pick_chunk(T, B, H)
    nc = T // tc

    def tb(d, c):                 # chunk block index: forward c, backward nc-1-c
        return d * (nc - 1 - 2 * c) + c

    kernel = functools.partial(_bigru_layer_kernel, tc=tc, hidden=H)

    in_specs = [
        pl.BlockSpec((None, 3, tc, B, H), lambda d, c: (d, 0, tb(d, c), 0, 0)),
        # Weight / bias blocks have a constant index map within a direction, so
        # the pipeline never re-copies them mid-pass; their (default) double
        # buffer is accounted for in the _pick_chunk VMEM budget.
        pl.BlockSpec((None, H, 3 * H), lambda d, c: (d, 0, 0)),
        pl.BlockSpec((None, 1, H), lambda d, c: (d, 0, 0)),
    ]

    fused_out = (H % 128 == 0)
    if fused_out:
        # Emit the concatenated (T, B, 2H) layout directly: lane-dense blocks,
        # no extra HBM round trip for a concat.
        out_shape = jax.ShapeDtypeStruct((T, B, 2 * H), jnp.bfloat16)
        out_specs = pl.BlockSpec((tc, B, H), lambda d, c: (tb(d, c), 0, d))
    else:
        # Small / unaligned H (demo shapes): per-direction output + XLA concat.
        out_shape = jax.ShapeDtypeStruct((2, T, B, H), jnp.bfloat16)
        out_specs = pl.BlockSpec((None, tc, B, H), lambda d, c: (d, tb(d, c), 0, 0))

    out = pl.pallas_call(
        kernel,
        out_shape=out_shape,
        grid=(2, nc),
        in_specs=in_specs,
        out_specs=out_specs,
        scratch_shapes=[pltpu.VMEM((B, H), jnp.float32)],      # h carry (f32)
        compiler_params=pltpu.CompilerParams(
            dimension_semantics=("parallel", "arbitrary"),     # dirs // on v7x
            vmem_limit_bytes=48 * 1024 * 1024),
    )(gi, w_hh, b_hn)

    if fused_out:
        return out
    return jnp.concatenate([out[0], out[1]], axis=-1)          # (T, B, 2H)


# ----------------------------------------------------------------------------
# Full model = bidirectional multi-layer GRU + Linear (eval-mode forward),
# matching the PyTorch module's view/reshape semantics.
# ----------------------------------------------------------------------------
def gru_model_forward(x, params, hidden_size, num_layers, pre_len):
    B, T, _ = x.shape
    H = hidden_size
    layer_in = jnp.transpose(x, (1, 0, 2)).astype(jnp.bfloat16)   # (T, B, D)

    for layer in range(num_layers):
        p = params["gru"][layer]
        b_ih, b_hh = p["b_ih"], p["b_hh"]                         # (2,3,H) f32
        # Fold b_hr / b_hz into the hoisted input-projection bias; keep b_hn.
        gi_bias = b_ih + jnp.concatenate(
            [b_hh[:, :2], jnp.zeros_like(b_hh[:, 2:])], axis=1)   # (2,3,H)
        b_hn = b_hh[:, 2][:, None, :]                             # (2,1,H)

        # Hoisted input projection: one MXU-friendly bf16 matmul for both
        # directions and all T*B positions, f32 accumulation, bf16 storage.
        gi = jnp.einsum("tbd,zgdh->zgtbh", layer_in, p["w_ih"],
                        preferred_element_type=jnp.float32)
        gi = (gi + gi_bias[:, :, None, None, :]).astype(jnp.bfloat16)  # (2,3,T,B,H)

        layer_in = bigru_recurrent(gi, p["w_hh"], b_hn)           # (T, B, 2H) bf16
        # TODO(synk): Dropout(0.3) between layers is training-only; omitted.

    # Output Linear as a plain XLA dot on (T*B, 2H); per-position op, so the
    # flatten order only has to be unflattened consistently.
    w_out_t, b_out = params["out"]
    flat = layer_in.reshape(T * B, 2 * H)
    outs = jnp.dot(flat, w_out_t, preferred_element_type=jnp.float32) + b_out
    return jnp.transpose(outs.reshape(T, B, pre_len), (1, 0, 2))  # (B, T, pre_len)


def init_params(key, input_size, hidden_size, num_layers, pre_len):
    H = hidden_size
    stdv = 1.0 / math.sqrt(H)
    gru_params = []
    for layer in range(num_layers):
        d_in = input_size if layer == 0 else 2 * H
        key, k1, k2, k3, k4 = jax.random.split(key, 5)
        gru_params.append({
            # w_ih: per-gate [r, z, n], pre-transposed for right-multiplication,
            #       bf16 (MXU-native).  Equals weight_ih_l{k}[.T] split per gate.
            "w_ih": jax.random.uniform(
                k1, (2, 3, d_in, H), jnp.float32, -stdv, stdv).astype(jnp.bfloat16),
            # w_hh: gates stacked along N -> (H, 3H) == weight_hh_l{k}.T, bf16.
            "w_hh": jax.random.uniform(
                k2, (2, H, 3 * H), jnp.float32, -stdv, stdv).astype(jnp.bfloat16),
            "b_ih": jax.random.uniform(k3, (2, 3, H), jnp.float32, -stdv, stdv),
            "b_hh": jax.random.uniform(k4, (2, 3, H), jnp.float32, -stdv, stdv),
        })
    key, k1, k2 = jax.random.split(key, 3)
    stdv_o = 1.0 / math.sqrt(2 * H)
    w_out_t = jax.random.uniform(k1, (2 * H, pre_len), jnp.float32, -stdv_o, stdv_o)
    b_out = jax.random.uniform(k2, (pre_len,), jnp.float32, -stdv_o, stdv_o)
    return {"gru": gru_params, "out": (w_out_t, b_out)}


if __name__ == "__main__":
    # Small shapes consistent with the module:
    # GRU(input_size, hidden, layers, bidirectional=True) + Linear(2H, pre_len)
    batch = 2
    time_steps = 8
    input_size = 16       # the module's `seq_len` (GRU input_size)
    hidden_size = 32
    num_layers = 2
    pre_len = 8

    key = jax.random.PRNGKey(0)
    key, xk = jax.random.split(key)
    x = jax.random.normal(xk, (batch, time_steps, input_size), jnp.float32)
    params = init_params(key, input_size, hidden_size, num_layers, pre_len)

    fwd = jax.jit(functools.partial(gru_model_forward,
                                    hidden_size=hidden_size,
                                    num_layers=num_layers,
                                    pre_len=pre_len))
    out = fwd(x, params)
    out = jax.block_until_ready(out)
    assert out.shape == (batch, time_steps, pre_len), out.shape
    assert bool(jnp.all(jnp.isfinite(out)))
    print("KERNEL_OK")
</pallas_src>

<mosaic_0001>
module attributes {stable_mosaic.version = 11 : i64} {
  func.func @_bigru_layer_kernel(%arg0: i32, %arg1: i32, %arg2: memref<1x3x8x2x32xbf16, #tpu.memory_space<vmem>>, %arg3: memref<1x32x96xbf16, #tpu.memory_space<vmem>>, %arg4: memref<1x1x32xf32, #tpu.memory_space<vmem>>, %arg5: memref<1x8x2x32xbf16, #tpu.memory_space<vmem>>, %arg6: memref<2x32xf32, #tpu.memory_space<vmem>>) attributes {dimension_semantics = [#tpu.dimension_semantics<parallel>, #tpu.dimension_semantics<arbitrary>], iteration_bounds = array<i64: 2, 1>, scalar_prefetch = 0 : i64, scratch_operands = 1 : i64, tpu.core_type = #tpu.core_type<tc>, window_params = [{transform_indices = @transform_0, window_bounds = array<i64: 1, 3, 8, 2, 32>}, {transform_indices = @transform_1, window_bounds = array<i64: 1, 32, 96>}, {transform_indices = @transform_2, window_bounds = array<i64: 1, 1, 32>}, {transform_indices = @transform_3, window_bounds = array<i64: 1, 8, 2, 32>}]} {
    %c0_i32 = arith.constant 0 : i32
    %0 = arith.cmpi eq, %arg1, %c0_i32 : i32
    %1 = arith.extui %0 : i1 to i32
    %c0_i32_0 = arith.constant 0 : i32
    %2 = arith.cmpi ne, %1, %c0_i32_0 : i32
    scf.if %2 {
      %cst = arith.constant 0.000000e+00 : f32
      %15 = vector.broadcast %cst : f32 to vector<2x32xf32>
      %c0_9 = arith.constant 0 : index
      %c0_10 = arith.constant 0 : index
      %16 = vector.load %arg6[%c0_9, %c0_10] : memref<2x32xf32, #tpu.memory_space<vmem>>, vector<2x32xf32>
      tpu.vector_store %arg6[%c0_9, %c0_10], %15 {strides = array<i32>} : memref<2x32xf32, #tpu.memory_space<vmem>>, vector<2x32xf32>,
    } else {
    }
    %c0 = arith.constant 0 : index
    %c0_1 = arith.constant 0 : index
    %c0_2 = arith.constant 0 : index
    %3 = vector.load %arg3[%c0, %c0_1, %c0_2] : memref<1x32x96xbf16, #tpu.memory_space<vmem>>, vector<1x32x96xbf16>
    %4 = vector.shape_cast %3 : vector<1x32x96xbf16> to vector<32x96xbf16>
    %c0_3 = arith.constant 0 : index
    %c0_4 = arith.constant 0 : index
    %c0_5 = arith.constant 0 : index
    %5 = vector.load %arg4[%c0_3, %c0_4, %c0_5] : memref<1x1x32xf32, #tpu.memory_space<vmem>>, vector<1x1x32xf32>
    %6 = vector.shape_cast %5 : vector<1x1x32xf32> to vector<1x32xf32>
    %7 = vector.shape_cast %6 : vector<1x32xf32> to vector<1x32xf32>
    %8 = vector.broadcast %7 : vector<1x32xf32> to vector<2x32xf32>
    %c0_i32_6 = arith.constant 0 : i32
    %9 = arith.cmpi eq, %arg0, %c0_i32_6 : i32
    %10 = arith.extui %9 : i1 to i32
    %c0_i32_7 = arith.constant 0 : i32
    %11 = arith.cmpi ne, %10, %c0_i32_7 : i32
    scf.if %11 {
      %c0_9 = arith.constant 0 : index
      %c0_10 = arith.constant 0 : index
      %15 = vector.load %arg6[%c0_9, %c0_10] : memref<2x32xf32, #tpu.memory_space<vmem>>, vector<2x32xf32>
      %16 = arith.truncf %15 : vector<2x32xf32> to vector<2x32xbf16>
      %cst = arith.constant dense<0.000000e+00> : vector<2x96xf32>
      %17 = tpu.matmul %16, %4, %cst {dimension_numbers = #tpu.dot_dimension_numbers<[1], [0], [0], [1], [0, 0, 1, 1], [], []>} : vector<2x32xbf16>, vector<32x96xbf16>, vector<2x96xf32> -> vector<2x96xf32>
      %18 = vector.extract_strided_slice %17 {offsets = [0, 0], sizes = [2, 32], strides = [1, 1]} : vector<2x96xf32> to vector<2x32xf32>
      %19 = vector.extract_strided_slice %17 {offsets = [0, 32], sizes = [2, 32], strides = [1, 1]} : vector<2x96xf32> to vector<2x32xf32>
      %20 = vector.extract_strided_slice %17 {offsets = [0, 64], sizes = [2, 32], strides = [1, 1]} : vector<2x96xf32> to vector<2x32xf32>
      %c0_11 = arith.constant 0 : index
      %c0_12 = arith.constant 0 : index
      %c0_13 = arith.constant 0 : index
      %c0_14 = arith.constant 0 : index
      %c0_15 = arith.constant 0 : index
      %21 = vector.load %arg2[%c0_11, %c0_12, %c0_13, %c0_14, %c0_15] : memref<1x3x8x2x32xbf16, #tpu.memory_space<vmem>>, vector<1x1x1x2x32xbf16>
      %22 = vector.shape_cast %21 : vector<1x1x1x2x32xbf16> to vector<2x32xbf16>
      %23 = arith.extf %22 : vector<2x32xbf16> to vector<2x32xf32>
      %c0_16 = arith.constant 0 : index
      %c1 = arith.constant 1 : index
      %c0_17 = arith.constant 0 : index
      %c0_18 = arith.constant 0 : index
      %c0_19 = arith.constant 0 : index
      %24 = vector.load %arg2[%c0_16, %c1, %c0_17, %c0_18, %c0_19] : memref<1x3x8x2x32xbf16, #tpu.memory_space<vmem>>, vector<1x1x1x2x32xbf16>
      %25 = vector.shape_cast %24 : vector<1x1x1x2x32xbf16> to vector<2x32xbf16>
      %26 = arith.extf %25 : vector<2x32xbf16> to vector<2x32xf32>
      %c0_20 = arith.constant 0 : index
      %c2 = arith.constant 2 : index
      %c0_21 = arith.constant 0 : index
      %c0_22 = arith.constant 0 : index
      %c0_23 = arith.constant 0 : index
      %27 = vector.load %arg2[%c0_20, %c2, %c0_21, %c0_22, %c0_23] : memref<1x3x8x2x32xbf16, #tpu.memory_space<vmem>>, vector<1x1x1x2x32xbf16>
      %28 = vector.shape_cast %27 : vector<1x1x1x2x32xbf16> to vector<2x32xbf16>
      %29 = arith.extf %28 : vector<2x32xbf16> to vector<2x32xf32>
      %30 = arith.addf %23, %18 : vector<2x32xf32>
      %31 = arith.negf %30 : vector<2x32xf32>
      %32 = math.exp %31 : vector<2x32xf32>
      %cst_24 = arith.constant 1.000000e+00 : f32
      %33 = vector.broadcast %cst_24 : f32 to vector<2x32xf32>
      %34 = arith.addf %33, %32 : vector<2x32xf32>
      %35 = arith.divf %33, %34 : vector<2x32xf32>
      %36 = arith.addf %26, %19 : vector<2x32xf32>
      %37 = arith.negf %36 : vector<2x32xf32>
      %38 = math.exp %37 : vector<2x32xf32>
      %cst_25 = arith.constant 1.000000e+00 : f32
      %39 = vector.broadcast %cst_25 : f32 to vector<2x32xf32>
      %40 = arith.addf %39, %38 : vector<2x32xf32>
      %41 = arith.divf %39, %40 : vector<2x32xf32>
      %42 = arith.addf %20, %8 : vector<2x32xf32>
      %43 = arith.mulf %35, %42 : vector<2x32xf32>
      %44 = arith.addf %29, %43 : vector<2x32xf32>
      %45 = math.tanh %44 : vector<2x32xf32>
      %cst_26 = arith.constant 1.000000e+00 : f32
      %46 = vector.broadcast %cst_26 : f32 to vector<2x32xf32>
      %47 = arith.subf %46, %41 : vector<2x32xf32>
      %48 = arith.mulf %47, %45 : vector<2x32xf32>
      %49 = arith.mulf %41, %15 : vector<2x32xf32>
      %50 = arith.addf %48, %49 : vector<2x32xf32>
      %51 = arith.truncf %50 : vector<2x32xf32> to vector<2x32xbf16>
      %c0_27 = arith.constant 0 : index
      %c0_28 = arith.constant 0 : index
      %c0_29 = arith.constant 0 : index
      %c0_30 = arith.constant 0 : index
      %52 = vector.load %arg5[%c0_27, %c0_28, %c0_29, %c0_30] : memref<1x8x2x32xbf16, #tpu.memory_space<vmem>>, vector<1x1x2x32xbf16>
      %53 = vector.shape_cast %52 : vector<1x1x2x32xbf16> to vector<2x32xbf16>
      %54 = vector.shape_cast %51 : vector<2x32xbf16> to vector<1x1x2x32xbf16>
      tpu.vector_store %arg5[%c0_27, %c0_28, %c0_29, %c0_30], %54 {strides = array<i32>} : memref<1x8x2x32xbf16, #tpu.memory_space<vmem>>, vector<1x1x2x32xbf16>,
      %55 = arith.truncf %50 : vector<2x32xf32> to vector<2x32xbf16>
      %cst_31 = arith.constant dense<0.000000e+00> : vector<2x96xf32>
      %56 = tpu.matmul %55, %4, %cst_31 {dimension_numbers = #tpu.dot_dimension_numbers<[1], [0], [0], [1], [0, 0, 1, 1], [], []>} : vector<2x32xbf16>, vector<32x96xbf16>, vector<2x96xf32> -> vector<2x96xf32>
      %57 = vector.extract_strided_slice %56 {offsets = [0, 0], sizes = [2, 32], strides = [1, 1]} : vector<2x96xf32> to vector<2x32xf32>
      %58 = vector.extract_strided_slice %56 {offsets = [0, 32], sizes = [2, 32], strides = [1, 1]} : vector<2x96xf32> to vector<2x32xf32>
      %59 = vector.extract_strided_slice %56 {offsets = [0, 64], sizes = [2, 32], strides = [1, 1]} : vector<2x96xf32> to vector<2x32xf32>
      %c0_32 = arith.constant 0 : index
      %c0_33 = arith.constant 0 : index
      %c1_34 = arith.constant 1 : index
      %c0_35 = arith.constant 0 : index
      %c0_36 = arith.constant 0 : index
      %60 = vector.load %arg2[%c0_32, %c0_33, %c1_34, %c0_35, %c0_36] : memref<1x3x8x2x32xbf16, #tpu.memory_space<vmem>>, vector<1x1x1x2x32xbf16>
      %61 = vector.shape_cast %60 : vector<1x1x1x2x32xbf16> to vector<2x32xbf16>
      %62 = arith.extf %61 : vector<2x32xbf16> to vector<2x32xf32>
      %c0_37 = arith.constant 0 : index
      %c1_38 = arith.constant 1 : index
      %c1_39 = arith.constant 1 : index
      %c0_40 = arith.constant 0 : index
      %c0_41 = arith.constant 0 : index
      %63 = vector.load %arg2[%c0_37, %c1_38, %c1_39, %c0_40, %c0_41] : memref<1x3x8x2x32xbf16, #tpu.memory_space<vmem>>, vector<1x1x1x2x32xbf16>
      %64 = vector.shape_cast %63 : vector<1x1x1x2x32xbf16> to vector<2x32xbf16>
      %65 = arith.extf %64 : vector<2x32xbf16> to vector<2x32xf32>
      %c0_42 = arith.constant 0 : index
      %c2_43 = arith.constant 2 : index
      %c1_44 = arith.constant 1 : index
      %c0_45 = arith.constant 0 : index
      %c0_46 = arith.constant 0 : index
      %66 = vector.load %arg2[%c0_42, %c2_43, %c1_44, %c0_45, %c0_46] : memref<1x3x8x2x32xbf16, #tpu.memory_space<vmem>>, vector<1x1x1x2x32xbf16>
      %67 = vector.shape_cast %66 : vector<1x1x1x2x32xbf16> to vector<2x32xbf16>
      %68 = arith.extf %67 : vector<2x32xbf16> to vector<2x32xf32>
      %69 = arith.addf %62, %57 : vector<2x32xf32>
      %70 = arith.negf %69 : vector<2x32xf32>
      %71 = math.exp %70 : vector<2x32xf32>
      %cst_47 = arith.constant 1.000000e+00 : f32
      %72 = vector.broadcast %cst_47 : f32 to vector<2x32xf32>
      %73 = arith.addf %72, %71 : vector<2x32xf32>
      %74 = arith.divf %72, %73 : vector<2x32xf32>
      %75 = arith.addf %65, %58 : vector<2x32xf32>
      %76 = arith.negf %75 : vector<2x32xf32>
      %77 = math.exp %76 : vector<2x32xf32>
      %cst_48 = arith.constant 1.000000e+00 : f32
      %78 = vector.broadcast %cst_48 : f32 to vector<2x32xf32>
      %79 = arith.addf %78, %77 : vector<2x32xf32>
      %80 = arith.divf %78, %79 : vector<2x32xf32>
      %81 = arith.addf %59, %8 : vector<2x32xf32>
      %82 = arith.mulf %74, %81 : vector<2x32xf32>
      %83 = arith.addf %68, %82 : vector<2x32xf32>
      %84 = math.tanh %83 : vector<2x32xf32>
      %cst_49 = arith.constant 1.000000e+00 : f32
      %85 = vector.broadcast %cst_49 : f32 to vector<2x32xf32>
      %86 = arith.subf %85, %80 : vector<2x32xf32>
      %87 = arith.mulf %86, %84 : vector<2x32xf32>
      %88 = arith.mulf %80, %50 : vector<2x32xf32>
      %89 = arith.addf %87, %88 : vector<2x32xf32>
      %90 = arith.truncf %89 : vector<2x32xf32> to vector<2x32xbf16>
      %c0_50 = arith.constant 0 : index
      %c1_51 = arith.constant 1 : index
      %c0_52 = arith.constant 0 : index
      %c0_53 = arith.constant 0 : index
      %91 = vector.load %arg5[%c0_50, %c1_51, %c0_52, %c0_53] : memref<1x8x2x32xbf16, #tpu.memory_space<vmem>>, vector<1x1x2x32xbf16>
      %92 = vector.shape_cast %91 : vector<1x1x2x32xbf16> to vector<2x32xbf16>
      %93 = vector.shape_cast %90 : vector<2x32xbf16> to vector<1x1x2x32xbf16>
      tpu.vector_store %arg5[%c0_50, %c1_51, %c0_52, %c0_53], %93 {strides = array<i32>} : memref<1x8x2x32xbf16, #tpu.memory_space<vmem>>, vector<1x1x2x32xbf16>,
      %94 = arith.truncf %89 : vector<2x32xf32> to vector<2x32xbf16>
      %cst_54 = arith.constant dense<0.000000e+00> : vector<2x96xf32>
      %95 = tpu.matmul %94, %4, %cst_54 {dimension_numbers = #tpu.dot_dimension_numbers<[1], [0], [0], [1], [0, 0, 1, 1], [], []>} : vector<2x32xbf16>, vector<32x96xbf16>, vector<2x96xf32> -> vector<2x96xf32>
      %96 = vector.extract_strided_slice %95 {offsets = [0, 0], sizes = [2, 32], strides = [1, 1]} : vector<2x96xf32> to vector<2x32xf32>
      %97 = vector.extract_strided_slice %95 {offsets = [0, 32], sizes = [2, 32], strides = [1, 1]} : vector<2x96xf32> to vector<2x32xf32>
      %98 = vector.extract_strided_slice %95 {offsets = [0, 64], sizes = [2, 32], strides = [1, 1]} : vector<2x96xf32> to vector<2x32xf32>
      %c0_55 = arith.constant 0 : index
      %c0_56 = arith.constant 0 : index
      %c2_57 = arith.constant 2 : index
      %c0_58 = arith.constant 0 : index
      %c0_59 = arith.constant 0 : index
      %99 = vector.load %arg2[%c0_55, %c0_56, %c2_57, %c0_58, %c0_59] : memref<1x3x8x2x32xbf16, #tpu.memory_space<vmem>>, vector<1x1x1x2x32xbf16>
      %100 = vector.shape_cast %99 : vector<1x1x1x2x32xbf16> to vector<2x32xbf16>
      %101 = arith.extf %100 : vector<2x32xbf16> to vector<2x32xf32>
      %c0_60 = arith.constant 0 : index
      %c1_61 = arith.constant 1 : index
      %c2_62 = arith.constant 2 : index
      %c0_63 = arith.constant 0 : index
      %c0_64 = arith.constant 0 : index
      %102 = vector.load %arg2[%c0_60, %c1_61, %c2_62, %c0_63, %c0_64] : memref<1x3x8x2x32xbf16, #tpu.memory_space<vmem>>, vector<1x1x1x2x32xbf16>
      %103 = vector.shape_cast %102 : vector<1x1x1x2x32xbf16> to vector<2x32xbf16>
      %104 = arith.extf %103 : vector<2x32xbf16> to vector<2x32xf32>
      %c0_65 = arith.constant 0 : index
      %c2_66 = arith.constant 2 : index
      %c2_67 = arith.constant 2 : index
      %c0_68 = arith.constant 0 : index
      %c0_69 = arith.constant 0 : index
      %105 = vector.load %arg2[%c0_65, %c2_66, %c2_67, %c0_68, %c0_69] : memref<1x3x8x2x32xbf16, #tpu.memory_space<vmem>>, vector<1x1x1x2x32xbf16>
      %106 = vector.shape_cast %105 : vector<1x1x1x2x32xbf16> to vector<2x32xbf16>
      %107 = arith.extf %106 : vector<2x32xbf16> to vector<2x32xf32>
      %108 = arith.addf %101, %96 : vector<2x32xf32>
      %109 = arith.negf %108 : vector<2x32xf32>
      %110 = math.exp %109 : vector<2x32xf32>
      %cst_70 = arith.constant 1.000000e+00 : f32
      %111 = vector.broadcast %cst_70 : f32 to vector<2x32xf32>
      %112 = arith.addf %111, %110 : vector<2x32xf32>
      %113 = arith.divf %111, %112 : vector<2x32xf32>
      %114 = arith.addf %104, %97 : vector<2x32xf32>
      %115 = arith.negf %114 : vector<2x32xf32>
      %116 = math.exp %115 : vector<2x32xf32>
      %cst_71 = arith.constant 1.000000e+00 : f32
      %117 = vector.broadcast %cst_71 : f32 to vector<2x32xf32>
      %118 = arith.addf %117, %116 : vector<2x32xf32>
      %119 = arith.divf %117, %118 : vector<2x32xf32>
      %120 = arith.addf %98, %8 : vector<2x32xf32>
      %121 = arith.mulf %113, %120 : vector<2x32xf32>
      %122 = arith.addf %107, %121 : vector<2x32xf32>
      %123 = math.tanh %122 : vector<2x32xf32>
      %cst_72 = arith.constant 1.000000e+00 : f32
      %124 = vector.broadcast %cst_72 : f32 to vector<2x32xf32>
      %125 = arith.subf %124, %119 : vector<2x32xf32>
      %126 = arith.mulf %125, %123 : vector<2x32xf32>
      %127 = arith.mulf %119, %89 : vector<2x32xf32>
      %128 = arith.addf %126, %127 : vector<2x32xf32>
      %129 = arith.truncf %128 : vector<2x32xf32> to vector<2x32xbf16>
      %c0_73 = arith.constant 0 : index
      %c2_74 = arith.constant 2 : index
      %c0_75 = arith.constant 0 : index
      %c0_76 = arith.constant 0 : index
      %130 = vector.load %arg5[%c0_73, %c2_74, %c0_75, %c0_76] : memref<1x8x2x32xbf16, #tpu.memory_space<vmem>>, vector<1x1x2x32xbf16>
      %131 = vector.shape_cast %130 : vector<1x1x2x32xbf16> to vector<2x32xbf16>
      %132 = vector.shape_cast %129 : vector<2x32xbf16> to vector<1x1x2x32xbf16>
      tpu.vector_store %arg5[%c0_73, %c2_74, %c0_75, %c0_76], %132 {strides = array<i32>} : memref<1x8x2x32xbf16, #tpu.memory_space<vmem>>, vector<1x1x2x32xbf16>,
      %133 = arith.truncf %128 : vector<2x32xf32> to vector<2x32xbf16>
      %cst_77 = arith.constant dense<0.000000e+00> : vector<2x96xf32>
      %134 = tpu.matmul %133, %4, %cst_77 {dimension_numbers = #tpu.dot_dimension_numbers<[1], [0], [0], [1], [0, 0, 1, 1], [], []>} : vector<2x32xbf16>, vector<32x96xbf16>, vector<2x96xf32> -> vector<2x96xf32>
      %135 = vector.extract_strided_slice %134 {offsets = [0, 0], sizes = [2, 32], strides = [1, 1]} : vector<2x96xf32> to vector<2x32xf32>
      %136 = vector.extract_strided_slice %134 {offsets = [0, 32], sizes = [2, 32], strides = [1, 1]} : vector<2x96xf32> to vector<2x32xf32>
      %137 = vector.extract_strided_slice %134 {offsets = [0, 64], sizes = [2, 32], strides = [1, 1]} : vector<2x96xf32> to vector<2x32xf32>
      %c0_78 = arith.constant 0 : index
      %c0_79 = arith.constant 0 : index
      %c3 = arith.constant 3 : index
      %c0_80 = arith.constant 0 : index
      %c0_81 = arith.constant 0 : index
      %138 = vector.load %arg2[%c0_78, %c0_79, %c3, %c0_80, %c0_81] : memref<1x3x8x2x32xbf16, #tpu.memory_space<vmem>>, vector<1x1x1x2x32xbf16>
      %139 = vector.shape_cast %138 : vector<1x1x1x2x32xbf16> to vector<2x32xbf16>
      %140 = arith.extf %139 : vector<2x32xbf16> to vector<2x32xf32>
      %c0_82 = arith.constant 0 : index
      %c1_83 = arith.constant 1 : index
      %c3_84 = arith.constant 3 : index
      %c0_85 = arith.constant 0 : index
      %c0_86 = arith.constant 0 : index
      %141 = vector.load %arg2[%c0_82, %c1_83, %c3_84, %c0_85, %c0_86] : memref<1x3x8x2x32xbf16, #tpu.memory_space<vmem>>, vector<1x1x1x2x32xbf16>
      %142 = vector.shape_cast %141 : vector<1x1x1x2x32xbf16> to vector<2x32xbf16>
      %143 = arith.extf %142 : vector<2x32xbf16> to vector<2x32xf32>
      %c0_87 = arith.constant 0 : index
      %c2_88 = arith.constant 2 : index
      %c3_89 = arith.constant 3 : index
      %c0_90 = arith.constant 0 : index
      %c0_91 = arith.constant 0 : index
      %144 = vector.load %arg2[%c0_87, %c2_88, %c3_89, %c0_90, %c0_91] : memref<1x3x8x2x32xbf16, #tpu.memory_space<vmem>>, vector<1x1x1x2x32xbf16>
      %145 = vector.shape_cast %144 : vector<1x1x1x2x32xbf16> to vector<2x32xbf16>
      %146 = arith.extf %145 : vector<2x32xbf16> to vector<2x32xf32>
      %147 = arith.addf %140, %135 : vector<2x32xf32>
      %148 = arith.negf %147 : vector<2x32xf32>
      %149 = math.exp %148 : vector<2x32xf32>
      %cst_92 = arith.constant 1.000000e+00 : f32
      %150 = vector.broadcast %cst_92 : f32 to vector<2x32xf32>
      %151 = arith.addf %150, %149 : vector<2x32xf32>
      %152 = arith.divf %150, %151 : vector<2x32xf32>
      %153 = arith.addf %143, %136 : vector<2x32xf32>
      %154 = arith.negf %153 : vector<2x32xf32>
      %155 = math.exp %154 : vector<2x32xf32>
      %cst_93 = arith.constant 1.000000e+00 : f32
      %156 = vector.broadcast %cst_93 : f32 to vector<2x32xf32>
      %157 = arith.addf %156, %155 : vector<2x32xf32>
      %158 = arith.divf %156, %157 : vector<2x32xf32>
      %159 = arith.addf %137, %8 : vector<2x32xf32>
      %160 = arith.mulf %152, %159 : vector<2x32xf32>
      %161 = arith.addf %146, %160 : vector<2x32xf32>
      %162 = math.tanh %161 : vector<2x32xf32>
      %cst_94 = arith.constant 1.000000e+00 : f32
      %163 = vector.broadcast %cst_94 : f32 to vector<2x32xf32>
      %164 = arith.subf %163, %158 : vector<2x32xf32>
      %165 = arith.mulf %164, %162 : vector<2x32xf32>
      %166 = arith.mulf %158, %128 : vector<2x32xf32>
      %167 = arith.addf %165, %166 : vector<2x32xf32>
      %168 = arith.truncf %167 : vector<2x32xf32> to vector<2x32xbf16>
      %c0_95 = arith.constant 0 : index
      %c3_96 = arith.constant 3 : index
      %c0_97 = arith.constant 0 : index
      %c0_98 = arith.constant 0 : index
      %169 = vector.load %arg5[%c0_95, %c3_96, %c0_97, %c0_98] : memref<1x8x2x32xbf16, #tpu.memory_space<vmem>>, vector<1x1x2x32xbf16>
      %170 = vector.shape_cast %169 : vector<1x1x2x32xbf16> to vector<2x32xbf16>
      %171 = vector.shape_cast %168 : vector<2x32xbf16> to vector<1x1x2x32xbf16>
      tpu.vector_store %arg5[%c0_95, %c3_96, %c0_97, %c0_98], %171 {strides = array<i32>} : memref<1x8x2x32xbf16, #tpu.memory_space<vmem>>, vector<1x1x2x32xbf16>,
      %172 = arith.truncf %167 : vector<2x32xf32> to vector<2x32xbf16>
      %cst_99 = arith.constant dense<0.000000e+00> : vector<2x96xf32>
      %173 = tpu.matmul %172, %4, %cst_99 {dimension_numbers = #tpu.dot_dimension_numbers<[1], [0], [0], [1], [0, 0, 1, 1], [], []>} : vector<2x32xbf16>, vector<32x96xbf16>, vector<2x96xf32> -> vector<2x96xf32>
      %174 = vector.extract_strided_slice %173 {offsets = [0, 0], sizes = [2, 32], strides = [1, 1]} : vector<2x96xf32> to vector<2x32xf32>
      %175 = vector.extract_strided_slice %173 {offsets = [0, 32], sizes = [2, 32], strides = [1, 1]} : vector<2x96xf32> to vector<2x32xf32>
      %176 = vector.extract_strided_slice %173 {offsets = [0, 64], sizes = [2, 32], strides = [1, 1]} : vector<2x96xf32> to vector<2x32xf32>
      %c0_100 = arith.constant 0 : index
      %c0_101 = arith.constant 0 : index
      %c4 = arith.constant 4 : index
      %c0_102 = arith.constant 0 : index
      %c0_103 = arith.constant 0 : index
      %177 = vector.load %arg2[%c0_100, %c0_101, %c4, %c0_102, %c0_103] : memref<1x3x8x2x32xbf16, #tpu.memory_space<vmem>>, vector<1x1x1x2x32xbf16>
      %178 = vector.shape_cast %177 : vector<1x1x1x2x32xbf16> to vector<2x32xbf16>
      %179 = arith.extf %178 : vector<2x32xbf16> to vector<2x32xf32>
      %c0_104 = arith.constant 0 : index
      %c1_105 = arith.constant 1 : index
      %c4_106 = arith.constant 4 : index
      %c0_107 = arith.constant 0 : index
      %c0_108 = arith.constant 0 : index
      %180 = vector.load %arg2[%c0_104, %c1_105, %c4_106, %c0_107, %c0_108] : memref<1x3x8x2x32xbf16, #tpu.memory_space<vmem>>, vector<1x1x1x2x32xbf16>
      %181 = vector.shape_cast %180 : vector<1x1x1x2x32xbf16> to vector<2x32xbf16>
      %182 = arith.extf %181 : vector<2x32xbf16> to vector<2x32xf32>
      %c0_109 = arith.constant 0 : index
      %c2_110 = arith.constant 2 : index
      %c4_111 = arith.constant 4 : index
      %c0_112 = arith.constant 0 : index
      %c0_113 = arith.constant 0 : index
      %183 = vector.load %arg2[%c0_109, %c2_110, %c4_111, %c0_112, %c0_113] : memref<1x3x8x2x32xbf16, #tpu.memory_space<vmem>>, vector<1x1x1x2x32xbf16>
      %184 = vector.shape_cast %183 : vector<1x1x1x2x32xbf16> to vector<2x32xbf16>
      %185 = arith.extf %184 : vector<2x32xbf16> to vector<2x32xf32>
      %186 = arith.addf %179, %174 : vector<2x32xf32>
      %187 = arith.negf %186 : vector<2x32xf32>
      %188 = math.exp %187 : vector<2x32xf32>
      %cst_114 = arith.constant 1.000000e+00 : f32
      %189 = vector.broadcast %cst_114 : f32 to vector<2x32xf32>
      %190 = arith.addf %189, %188 : vector<2x32xf32>
      %191 = arith.divf %189, %190 : vector<2x32xf32>
      %192 = arith.addf %182, %175 : vector<2x32xf32>
      %193 = arith.negf %192 : vector<2x32xf32>
      %194 = math.exp %193 : vector<2x32xf32>
      %cst_115 = arith.constant 1.000000e+00 : f32
      %195 = vector.broadcast %cst_115 : f32 to vector<2x32xf32>
      %196 = arith.addf %195, %194 : vector<2x32xf32>
      %197 = arith.divf %195, %196 : vector<2x32xf32>
      %198 = arith.addf %176, %8 : vector<2x32xf32>
      %199 = arith.mulf %191, %198 : vector<2x32xf32>
      %200 = arith.addf %185, %199 : vector<2x32xf32>
      %201 = math.tanh %200 : vector<2x32xf32>
      %cst_116 = arith.constant 1.000000e+00 : f32
      %202 = vector.broadcast %cst_116 : f32 to vector<2x32xf32>
      %203 = arith.subf %202, %197 : vector<2x32xf32>
      %204 = arith.mulf %203, %201 : vector<2x32xf32>
      %205 = arith.mulf %197, %167 : vector<2x32xf32>
      %206 = arith.addf %204, %205 : vector<2x32xf32>
      %207 = arith.truncf %206 : vector<2x32xf32> to vector<2x32xbf16>
      %c0_117 = arith.constant 0 : index
      %c4_118 = arith.constant 4 : index
      %c0_119 = arith.constant 0 : index
      %c0_120 = arith.constant 0 : index
      %208 = vector.load %arg5[%c0_117, %c4_118, %c0_119, %c0_120] : memref<1x8x2x32xbf16, #tpu.memory_space<vmem>>, vector<1x1x2x32xbf16>
      %209 = vector.shape_cast %208 : vector<1x1x2x32xbf16> to vector<2x32xbf16>
      %210 = vector.shape_cast %207 : vector<2x32xbf16> to vector<1x1x2x32xbf16>
      tpu.vector_store %arg5[%c0_117, %c4_118, %c0_119, %c0_120], %210 {strides = array<i32>} : memref<1x8x2x32xbf16, #tpu.memory_space<vmem>>, vector<1x1x2x32xbf16>,
      %211 = arith.truncf %206 : vector<2x32xf32> to vector<2x32xbf16>
      %cst_121 = arith.constant dense<0.000000e+00> : vector<2x96xf32>
      %212 = tpu.matmul %211, %4, %cst_121 {dimension_numbers = #tpu.dot_dimension_numbers<[1], [0], [0], [1], [0, 0, 1, 1], [], []>} : vector<2x32xbf16>, vector<32x96xbf16>, vector<2x96xf32> -> vector<2x96xf32>
      %213 = vector.extract_strided_slice %212 {offsets = [0, 0], sizes = [2, 32], strides = [1, 1]} : vector<2x96xf32> to vector<2x32xf32>
      %214 = vector.extract_strided_slice %212 {offsets = [0, 32], sizes = [2, 32], strides = [1, 1]} : vector<2x96xf32> to vector<2x32xf32>
      %215 = vector.extract_strided_slice %212 {offsets = [0, 64], sizes = [2, 32], strides = [1, 1]} : vector<2x96xf32> to vector<2x32xf32>
      %c0_122 = arith.constant 0 : index
      %c0_123 = arith.constant 0 : index
      %c5 = arith.constant 5 : index
      %c0_124 = arith.constant 0 : index
      %c0_125 = arith.constant 0 : index
      %216 = vector.load %arg2[%c0_122, %c0_123, %c5, %c0_124, %c0_125] : memref<1x3x8x2x32xbf16, #tpu.memory_space<vmem>>, vector<1x1x1x2x32xbf16>
      %217 = vector.shape_cast %216 : vector<1x1x1x2x32xbf16> to vector<2x32xbf16>
      %218 = arith.extf %217 : vector<2x32xbf16> to vector<2x32xf32>
      %c0_126 = arith.constant 0 : index
      %c1_127 = arith.constant 1 : index
      %c5_128 = arith.constant 5 : index
      %c0_129 = arith.constant 0 : index
      %c0_130 = arith.constant 0 : index
      %219 = vector.load %arg2[%c0_126, %c1_127, %c5_128, %c0_129, %c0_130] : memref<1x3x8x2x32xbf16, #tpu.memory_space<vmem>>, vector<1x1x1x2x32xbf16>
      %220 = vector.shape_cast %219 : vector<1x1x1x2x32xbf16> to vector<2x32xbf16>
      %221 = arith.extf %220 : vector<2x32xbf16> to vector<2x32xf32>
      %c0_131 = arith.constant 0 : index
      %c2_132 = arith.constant 2 : index
      %c5_133 = arith.constant 5 : index
      %c0_134 = arith.constant 0 : index
      %c0_135 = arith.constant 0 : index
      %222 = vector.load %arg2[%c0_131, %c2_132, %c5_133, %c0_134, %c0_135] : memref<1x3x8x2x32xbf16, #tpu.memory_space<vmem>>, vector<1x1x1x2x32xbf16>
      %223 = vector.shape_cast %222 : vector<1x1x1x2x32xbf16> to vector<2x32xbf16>
      %224 = arith.extf %223 : vector<2x32xbf16> to vector<2x32xf32>
      %225 = arith.addf %218, %213 : vector<2x32xf32>
      %226 = arith.negf %225 : vector<2x32xf32>
      %227 = math.exp %226 : vector<2x32xf32>
      %cst_136 = arith.constant 1.000000e+00 : f32
      %228 = vector.broadcast %cst_136 : f32 to vector<2x32xf32>
      %229 = arith.addf %228, %227 : vector<2x32xf32>
      %230 = arith.divf %228, %229 : vector<2x32xf32>
      %231 = arith.addf %221, %214 : vector<2x32xf32>
      %232 = arith.negf %231 : vector<2x32xf32>
      %233 = math.exp %232 : vector<2x32xf32>
      %cst_137 = arith.constant 1.000000e+00 : f32
      %234 = vector.broadcast %cst_137 : f32 to vector<2x32xf32>
      %235 = arith.addf %234, %233 : vector<2x32xf32>
      %236 = arith.divf %234, %235 : vector<2x32xf32>
      %237 = arith.addf %215, %8 : vector<2x32xf32>
      %238 = arith.mulf %230, %237 : vector<2x32xf32>
      %239 = arith.addf %224, %238 : vector<2x32xf32>
      %240 = math.tanh %239 : vector<2x32xf32>
      %cst_138 = arith.constant 1.000000e+00 : f32
      %241 = vector.broadcast %cst_138 : f32 to vector<2x32xf32>
      %242 = arith.subf %241, %236 : vector<2x32xf32>
      %243 = arith.mulf %242, %240 : vector<2x32xf32>
      %244 = arith.mulf %236, %206 : vector<2x32xf32>
      %245 = arith.addf %243, %244 : vector<2x32xf32>
      %246 = arith.truncf %245 : vector<2x32xf32> to vector<2x32xbf16>
      %c0_139 = arith.constant 0 : index
      %c5_140 = arith.constant 5 : index
      %c0_141 = arith.constant 0 : index
      %c0_142 = arith.constant 0 : index
      %247 = vector.load %arg5[%c0_139, %c5_140, %c0_141, %c0_142] : memref<1x8x2x32xbf16, #tpu.memory_space<vmem>>, vector<1x1x2x32xbf16>
      %248 = vector.shape_cast %247 : vector<1x1x2x32xbf16> to vector<2x32xbf16>
      %249 = vector.shape_cast %246 : vector<2x32xbf16> to vector<1x1x2x32xbf16>
      tpu.vector_store %arg5[%c0_139, %c5_140, %c0_141, %c0_142], %249 {strides = array<i32>} : memref<1x8x2x32xbf16, #tpu.memory_space<vmem>>, vector<1x1x2x32xbf16>,
      %250 = arith.truncf %245 : vector<2x32xf32> to vector<2x32xbf16>
      %cst_143 = arith.constant dense<0.000000e+00> : vector<2x96xf32>
      %251 = tpu.matmul %250, %4, %cst_143 {dimension_numbers = #tpu.dot_dimension_numbers<[1], [0], [0], [1], [0, 0, 1, 1], [], []>} : vector<2x32xbf16>, vector<32x96xbf16>, vector<2x96xf32> -> vector<2x96xf32>
      %252 = vector.extract_strided_slice %251 {offsets = [0, 0], sizes = [2, 32], strides = [1, 1]} : vector<2x96xf32> to vector<2x32xf32>
      %253 = vector.extract_strided_slice %251 {offsets = [0, 32], sizes = [2, 32], strides = [1, 1]} : vector<2x96xf32> to vector<2x32xf32>
      %254 = vector.extract_strided_slice %251 {offsets = [0, 64], sizes = [2, 32], strides = [1, 1]} : vector<2x96xf32> to vector<2x32xf32>
      %c0_144 = arith.constant 0 : index
      %c0_145 = arith.constant 0 : index
      %c6 = arith.constant 6 : index
      %c0_146 = arith.constant 0 : index
      %c0_147 = arith.constant 0 : index
      %255 = vector.load %arg2[%c0_144, %c0_145, %c6, %c0_146, %c0_147] : memref<1x3x8x2x32xbf16, #tpu.memory_space<vmem>>, vector<1x1x1x2x32xbf16>
      %256 = vector.shape_cast %255 : vector<1x1x1x2x32xbf16> to vector<2x32xbf16>
      %257 = arith.extf %256 : vector<2x32xbf16> to vector<2x32xf32>
      %c0_148 = arith.constant 0 : index
      %c1_149 = arith.constant 1 : index
      %c6_150 = arith.constant 6 : index
      %c0_151 = arith.constant 0 : index
      %c0_152 = arith.constant 0 : index
      %258 = vector.load %arg2[%c0_148, %c1_149, %c6_150, %c0_151, %c0_152] : memref<1x3x8x2x32xbf16, #tpu.memory_space<vmem>>, vector<1x1x1x2x32xbf16>
      %259 = vector.shape_cast %258 : vector<1x1x1x2x32xbf16> to vector<2x32xbf16>
      %260 = arith.extf %259 : vector<2x32xbf16> to vector<2x32xf32>
      %c0_153 = arith.constant 0 : index
      %c2_154 = arith.constant 2 : index
      %c6_155 = arith.constant 6 : index
      %c0_156 = arith.constant 0 : index
      %c0_157 = arith.constant 0 : index
      %261 = vector.load %arg2[%c0_153, %c2_154, %c6_155, %c0_156, %c0_157] : memref<1x3x8x2x32xbf16, #tpu.memory_space<vmem>>, vector<1x1x1x2x32xbf16>
      %262 = vector.shape_cast %261 : vector<1x1x1x2x32xbf16> to vector<2x32xbf16>
      %263 = arith.extf %262 : vector<2x32xbf16> to vector<2x32xf32>
      %264 = arith.addf %257, %252 : vector<2x32xf32>
      %265 = arith.negf %264 : vector<2x32xf32>
      %266 = math.exp %265 : vector<2x32xf32>
      %cst_158 = arith.constant 1.000000e+00 : f32
      %267 = vector.broadcast %cst_158 : f32 to vector<2x32xf32>
      %268 = arith.addf %267, %266 : vector<2x32xf32>
      %269 = arith.divf %267, %268 : vector<2x32xf32>
      %270 = arith.addf %260, %253 : vector<2x32xf32>
      %271 = arith.negf %270 : vector<2x32xf32>
      %272 = math.exp %271 : vector<2x32xf32>
      %cst_159 = arith.constant 1.000000e+00 : f32
      %273 = vector.broadcast %cst_159 : f32 to vector<2x32xf32>
      %274 = arith.addf %273, %272 : vector<2x32xf32>
      %275 = arith.divf %273, %274 : vector<2x32xf32>
      %276 = arith.addf %254, %8 : vector<2x32xf32>
      %277 = arith.mulf %269, %276 : vector<2x32xf32>
      %278 = arith.addf %263, %277 : vector<2x32xf32>
      %279 = math.tanh %278 : vector<2x32xf32>
      %cst_160 = arith.constant 1.000000e+00 : f32
      %280 = vector.broadcast %cst_160 : f32 to vector<2x32xf32>
      %281 = arith.subf %280, %275 : vector<2x32xf32>
      %282 = arith.mulf %281, %279 : vector<2x32xf32>
      %283 = arith.mulf %275, %245 : vector<2x32xf32>
      %284 = arith.addf %282, %283 : vector<2x32xf32>
      %285 = arith.truncf %284 : vector<2x32xf32> to vector<2x32xbf16>
      %c0_161 = arith.constant 0 : index
      %c6_162 = arith.constant 6 : index
      %c0_163 = arith.constant 0 : index
      %c0_164 = arith.constant 0 : index
      %286 = vector.load %arg5[%c0_161, %c6_162, %c0_163, %c0_164] : memref<1x8x2x32xbf16, #tpu.memory_space<vmem>>, vector<1x1x2x32xbf16>
      %287 = vector.shape_cast %286 : vector<1x1x2x32xbf16> to vector<2x32xbf16>
      %288 = vector.shape_cast %285 : vector<2x32xbf16> to vector<1x1x2x32xbf16>
      tpu.vector_store %arg5[%c0_161, %c6_162, %c0_163, %c0_164], %288 {strides = array<i32>} : memref<1x8x2x32xbf16, #tpu.memory_space<vmem>>, vector<1x1x2x32xbf16>,
      %289 = arith.truncf %284 : vector<2x32xf32> to vector<2x32xbf16>
      %cst_165 = arith.constant dense<0.000000e+00> : vector<2x96xf32>
      %290 = tpu.matmul %289, %4, %cst_165 {dimension_numbers = #tpu.dot_dimension_numbers<[1], [0], [0], [1], [0, 0, 1, 1], [], []>} : vector<2x32xbf16>, vector<32x96xbf16>, vector<2x96xf32> -> vector<2x96xf32>
      %291 = vector.extract_strided_slice %290 {offsets = [0, 0], sizes = [2, 32], strides = [1, 1]} : vector<2x96xf32> to vector<2x32xf32>
      %292 = vector.extract_strided_slice %290 {offsets = [0, 32], sizes = [2, 32], strides = [1, 1]} : vector<2x96xf32> to vector<2x32xf32>
      %293 = vector.extract_strided_slice %290 {offsets = [0, 64], sizes = [2, 32], strides = [1, 1]} : vector<2x96xf32> to vector<2x32xf32>
      %c0_166 = arith.constant 0 : index
      %c0_167 = arith.constant 0 : index
      %c7 = arith.constant 7 : index
      %c0_168 = arith.constant 0 : index
      %c0_169 = arith.constant 0 : index
      %294 = vector.load %arg2[%c0_166, %c0_167, %c7, %c0_168, %c0_169] : memref<1x3x8x2x32xbf16, #tpu.memory_space<vmem>>, vector<1x1x1x2x32xbf16>
      %295 = vector.shape_cast %294 : vector<1x1x1x2x32xbf16> to vector<2x32xbf16>
      %296 = arith.extf %295 : vector<2x32xbf16> to vector<2x32xf32>
      %c0_170 = arith.constant 0 : index
      %c1_171 = arith.constant 1 : index
      %c7_172 = arith.constant 7 : index
      %c0_173 = arith.constant 0 : index
      %c0_174 = arith.constant 0 : index
      %297 = vector.load %arg2[%c0_170, %c1_171, %c7_172, %c0_173, %c0_174] : memref<1x3x8x2x32xbf16, #tpu.memory_space<vmem>>, vector<1x1x1x2x32xbf16>
      %298 = vector.shape_cast %297 : vector<1x1x1x2x32xbf16> to vector<2x32xbf16>
      %299 = arith.extf %298 : vector<2x32xbf16> to vector<2x32xf32>
      %c0_175 = arith.constant 0 : index
      %c2_176 = arith.constant 2 : index
      %c7_177 = arith.constant 7 : index
      %c0_178 = arith.constant 0 : index
      %c0_179 = arith.constant 0 : index
      %300 = vector.load %arg2[%c0_175, %c2_176, %c7_177, %c0_178, %c0_179] : memref<1x3x8x2x32xbf16, #tpu.memory_space<vmem>>, vector<1x1x1x2x32xbf16>
      %301 = vector.shape_cast %300 : vector<1x1x1x2x32xbf16> to vector<2x32xbf16>
      %302 = arith.extf %301 : vector<2x32xbf16> to vector<2x32xf32>
      %303 = arith.addf %296, %291 : vector<2x32xf32>
      %304 = arith.negf %303 : vector<2x32xf32>
      %305 = math.exp %304 : vector<2x32xf32>
      %cst_180 = arith.constant 1.000000e+00 : f32
      %306 = vector.broadcast %cst_180 : f32 to vector<2x32xf32>
      %307 = arith.addf %306, %305 : vector<2x32xf32>
      %308 = arith.divf %306, %307 : vector<2x32xf32>
      %309 = arith.addf %299, %292 : vector<2x32xf32>
      %310 = arith.negf %309 : vector<2x32xf32>
      %311 = math.exp %310 : vector<2x32xf32>
      %cst_181 = arith.constant 1.000000e+00 : f32
      %312 = vector.broadcast %cst_181 : f32 to vector<2x32xf32>
      %313 = arith.addf %312, %311 : vector<2x32xf32>
      %314 = arith.divf %312, %313 : vector<2x32xf32>
      %315 = arith.addf %293, %8 : vector<2x32xf32>
      %316 = arith.mulf %308, %315 : vector<2x32xf32>
      %317 = arith.addf %302, %316 : vector<2x32xf32>
      %318 = math.tanh %317 : vector<2x32xf32>
      %cst_182 = arith.constant 1.000000e+00 : f32
      %319 = vector.broadcast %cst_182 : f32 to vector<2x32xf32>
      %320 = arith.subf %319, %314 : vector<2x32xf32>
      %321 = arith.mulf %320, %318 : vector<2x32xf32>
      %322 = arith.mulf %314, %284 : vector<2x32xf32>
      %323 = arith.addf %321, %322 : vector<2x32xf32>
      %324 = arith.truncf %323 : vector<2x32xf32> to vector<2x32xbf16>
      %c0_183 = arith.constant 0 : index
      %c7_184 = arith.constant 7 : index
      %c0_185 = arith.constant 0 : index
      %c0_186 = arith.constant 0 : index
      %325 = vector.load %arg5[%c0_183, %c7_184, %c0_185, %c0_186] : memref<1x8x2x32xbf16, #tpu.memory_space<vmem>>, vector<1x1x2x32xbf16>
      %326 = vector.shape_cast %325 : vector<1x1x2x32xbf16> to vector<2x32xbf16>
      %327 = vector.shape_cast %324 : vector<2x32xbf16> to vector<1x1x2x32xbf16>
      tpu.vector_store %arg5[%c0_183, %c7_184, %c0_185, %c0_186], %327 {strides = array<i32>} : memref<1x8x2x32xbf16, #tpu.memory_space<vmem>>, vector<1x1x2x32xbf16>,
      %c0_187 = arith.constant 0 : index
      %c0_188 = arith.constant 0 : index
      %328 = vector.load %arg6[%c0_187, %c0_188] : memref<2x32xf32, #tpu.memory_space<vmem>>, vector<2x32xf32>
      tpu.vector_store %arg6[%c0_187, %c0_188], %323 {strides = array<i32>} : memref<2x32xf32, #tpu.memory_space<vmem>>, vector<2x32xf32>,
    } else {
    }
    %c1_i32 = arith.constant 1 : i32
    %12 = arith.cmpi eq, %arg0, %c1_i32 : i32
    %13 = arith.extui %12 : i1 to i32
    %c0_i32_8 = arith.constant 0 : i32
    %14 = arith.cmpi ne, %13, %c0_i32_8 : i32
    scf.if %14 {
      %c0_9 = arith.constant 0 : index
      %c0_10 = arith.constant 0 : index
      %15 = vector.load %arg6[%c0_9, %c0_10] : memref<2x32xf32, #tpu.memory_space<vmem>>, vector<2x32xf32>
      %16 = arith.truncf %15 : vector<2x32xf32> to vector<2x32xbf16>
      %cst = arith.constant dense<0.000000e+00> : vector<2x96xf32>
      %17 = tpu.matmul %16, %4, %cst {dimension_numbers = #tpu.dot_dimension_numbers<[1], [0], [0], [1], [0, 0, 1, 1], [], []>} : vector<2x32xbf16>, vector<32x96xbf16>, vector<2x96xf32> -> vector<2x96xf32>
      %18 = vector.extract_strided_slice %17 {offsets = [0, 0], sizes = [2, 32], strides = [1, 1]} : vector<2x96xf32> to vector<2x32xf32>
      %19 = vector.extract_strided_slice %17 {offsets = [0, 32], sizes = [2, 32], strides = [1, 1]} : vector<2x96xf32> to vector<2x32xf32>
      %20 = vector.extract_strided_slice %17 {offsets = [0, 64], sizes = [2, 32], strides = [1, 1]} : vector<2x96xf32> to vector<2x32xf32>
      %c0_11 = arith.constant 0 : index
      %c0_12 = arith.constant 0 : index
      %c7 = arith.constant 7 : index
      %c0_13 = arith.constant 0 : index
      %c0_14 = arith.constant 0 : index
      %21 = vector.load %arg2[%c0_11, %c0_12, %c7, %c0_13, %c0_14] : memref<1x3x8x2x32xbf16, #tpu.memory_space<vmem>>, vector<1x1x1x2x32xbf16>
      %22 = vector.shape_cast %21 : vector<1x1x1x2x32xbf16> to vector<2x32xbf16>
      %23 = arith.extf %22 : vector<2x32xbf16> to vector<2x32xf32>
      %c0_15 = arith.constant 0 : index
      %c1 = arith.constant 1 : index
      %c7_16 = arith.constant 7 : index
      %c0_17 = arith.constant 0 : index
      %c0_18 = arith.constant 0 : index
      %24 = vector.load %arg2[%c0_15, %c1, %c7_16, %c0_17, %c0_18] : memref<1x3x8x2x32xbf16, #tpu.memory_space<vmem>>, vector<1x1x1x2x32xbf16>
      %25 = vector.shape_cast %24 : vector<1x1x1x2x32xbf16> to vector<2x32xbf16>
      %26 = arith.extf %25 : vector<2x32xbf16> to vector<2x32xf32>
      %c0_19 = arith.constant 0 : index
      %c2 = arith.constant 2 : index
      %c7_20 = arith.constant 7 : index
      %c0_21 = arith.constant 0 : index
      %c0_22 = arith.constant 0 : index
      %27 = vector.load %arg2[%c0_19, %c2, %c7_20, %c0_21, %c0_22] : memref<1x3x8x2x32xbf16, #tpu.memory_space<vmem>>, vector<1x1x1x2x32xbf16>
      %28 = vector.shape_cast %27 : vector<1x1x1x2x32xbf16> to vector<2x32xbf16>
      %29 = arith.extf %28 : vector<2x32xbf16> to vector<2x32xf32>
      %30 = arith.addf %23, %18 : vector<2x32xf32>
      %31 = arith.negf %30 : vector<2x32xf32>
      %32 = math.exp %31 : vector<2x32xf32>
      %cst_23 = arith.constant 1.000000e+00 : f32
      %33 = vector.broadcast %cst_23 : f32 to vector<2x32xf32>
      %34 = arith.addf %33, %32 : vector<2x32xf32>
      %35 = arith.divf %33, %34 : vector<2x32xf32>
      %36 = arith.addf %26, %19 : vector<2x32xf32>
      %37 = arith.negf %36 : vector<2x32xf32>
      %38 = math.exp %37 : vector<2x32xf32>
      %cst_24 = arith.constant 1.000000e+00 : f32
      %39 = vector.broadcast %cst_24 : f32 to vector<2x32xf32>
      %40 = arith.addf %39, %38 : vector<2x32xf32>
      %41 = arith.divf %39, %40 : vector<2x32xf32>
      %42 = arith.addf %20, %8 : vector<2x32xf32>
      %43 = arith.mulf %35, %42 : vector<2x32xf32>
      %44 = arith.addf %29, %43 : vector<2x32xf32>
      %45 = math.tanh %44 : vector<2x32xf32>
      %cst_25 = arith.constant 1.000000e+00 : f32
      %46 = vector.broadcast %cst_25 : f32 to vector<2x32xf32>
      %47 = arith.subf %46, %41 : vector<2x32xf32>
      %48 = arith.mulf %47, %45 : vector<2x32xf32>
      %49 = arith.mulf %41, %15 : vector<2x32xf32>
      %50 = arith.addf %48, %49 : vector<2x32xf32>
      %51 = arith.truncf %50 : vector<2x32xf32> to vector<2x32xbf16>
      %c0_26 = arith.constant 0 : index
      %c7_27 = arith.constant 7 : index
      %c0_28 = arith.constant 0 : index
      %c0_29 = arith.constant 0 : index
      %52 = vector.load %arg5[%c0_26, %c7_27, %c0_28, %c0_29] : memref<1x8x2x32xbf16, #tpu.memory_space<vmem>>, vector<1x1x2x32xbf16>
      %53 = vector.shape_cast %52 : vector<1x1x2x32xbf16> to vector<2x32xbf16>
      %54 = vector.shape_cast %51 : vector<2x32xbf16> to vector<1x1x2x32xbf16>
      tpu.vector_store %arg5[%c0_26, %c7_27, %c0_28, %c0_29], %54 {strides = array<i32>} : memref<1x8x2x32xbf16, #tpu.memory_space<vmem>>, vector<1x1x2x32xbf16>,
      %55 = arith.truncf %50 : vector<2x32xf32> to vector<2x32xbf16>
      %cst_30 = arith.constant dense<0.000000e+00> : vector<2x96xf32>
      %56 = tpu.matmul %55, %4, %cst_30 {dimension_numbers = #tpu.dot_dimension_numbers<[1], [0], [0], [1], [0, 0, 1, 1], [], []>} : vector<2x32xbf16>, vector<32x96xbf16>, vector<2x96xf32> -> vector<2x96xf32>
      %57 = vector.extract_strided_slice %56 {offsets = [0, 0], sizes = [2, 32], strides = [1, 1]} : vector<2x96xf32> to vector<2x32xf32>
      %58 = vector.extract_strided_slice %56 {offsets = [0, 32], sizes = [2, 32], strides = [1, 1]} : vector<2x96xf32> to vector<2x32xf32>
      %59 = vector.extract_strided_slice %56 {offsets = [0, 64], sizes = [2, 32], strides = [1, 1]} : vector<2x96xf32> to vector<2x32xf32>
      %c0_31 = arith.constant 0 : index
      %c0_32 = arith.constant 0 : index
      %c6 = arith.constant 6 : index
      %c0_33 = arith.constant 0 : index
      %c0_34 = arith.constant 0 : index
      %60 = vector.load %arg2[%c0_31, %c0_32, %c6, %c0_33, %c0_34] : memref<1x3x8x2x32xbf16, #tpu.memory_space<vmem>>, vector<1x1x1x2x32xbf16>
      %61 = vector.shape_cast %60 : vector<1x1x1x2x32xbf16> to vector<2x32xbf16>
      %62 = arith.extf %61 : vector<2x32xbf16> to vector<2x32xf32>
      %c0_35 = arith.constant 0 : index
      %c1_36 = arith.constant 1 : index
      %c6_37 = arith.constant 6 : index
      %c0_38 = arith.constant 0 : index
      %c0_39 = arith.constant 0 : index
      %63 = vector.load %arg2[%c0_35, %c1_36, %c6_37, %c0_38, %c0_39] : memref<1x3x8x2x32xbf16, #tpu.memory_space<vmem>>, vector<1x1x1x2x32xbf16>
      %64 = vector.shape_cast %63 : vector<1x1x1x2x32xbf16> to vector<2x32xbf16>
      %65 = arith.extf %64 : vector<2x32xbf16> to vector<2x32xf32>
      %c0_40 = arith.constant 0 : index
      %c2_41 = arith.constant 2 : index
      %c6_42 = arith.constant 6 : index
      %c0_43 = arith.constant 0 : index
      %c0_44 = arith.constant 0 : index
      %66 = vector.load %arg2[%c0_40, %c2_41, %c6_42, %c0_43, %c0_44] : memref<1x3x8x2x32xbf16, #tpu.memory_space<vmem>>, vector<1x1x1x2x32xbf16>
      %67 = vector.shape_cast %66 : vector<1x1x1x2x32xbf16> to vector<2x32xbf16>
      %68 = arith.extf %67 : vector<2x32xbf16> to vector<2x32xf32>
      %69 = arith.addf %62, %57 : vector<2x32xf32>
      %70 = arith.negf %69 : vector<2x32xf32>
      %71 = math.exp %70 : vector<2x32xf32>
      %cst_45 = arith.constant 1.000000e+00 : f32
      %72 = vector.broadcast %cst_45 : f32 to vector<2x32xf32>
      %73 = arith.addf %72, %71 : vector<2x32xf32>
      %74 = arith.divf %72, %73 : vector<2x32xf32>
      %75 = arith.addf %65, %58 : vector<2x32xf32>
      %76 = arith.negf %75 : vector<2x32xf32>
      %77 = math.exp %76 : vector<2x32xf32>
      %cst_46 = arith.constant 1.000000e+00 : f32
      %78 = vector.broadcast %cst_46 : f32 to vector<2x32xf32>
      %79 = arith.addf %78, %77 : vector<2x32xf32>
      %80 = arith.divf %78, %79 : vector<2x32xf32>
      %81 = arith.addf %59, %8 : vector<2x32xf32>
      %82 = arith.mulf %74, %81 : vector<2x32xf32>
      %83 = arith.addf %68, %82 : vector<2x32xf32>
      %84 = math.tanh %83 : vector<2x32xf32>
      %cst_47 = arith.constant 1.000000e+00 : f32
      %85 = vector.broadcast %cst_47 : f32 to vector<2x32xf32>
      %86 = arith.subf %85, %80 : vector<2x32xf32>
      %87 = arith.mulf %86, %84 : vector<2x32xf32>
      %88 = arith.mulf %80, %50 : vector<2x32xf32>
      %89 = arith.addf %87, %88 : vector<2x32xf32>
      %90 = arith.truncf %89 : vector<2x32xf32> to vector<2x32xbf16>
      %c0_48 = arith.constant 0 : index
      %c6_49 = arith.constant 6 : index
      %c0_50 = arith.constant 0 : index
      %c0_51 = arith.constant 0 : index
      %91 = vector.load %arg5[%c0_48, %c6_49, %c0_50, %c0_51] : memref<1x8x2x32xbf16, #tpu.memory_space<vmem>>, vector<1x1x2x32xbf16>
      %92 = vector.shape_cast %91 : vector<1x1x2x32xbf16> to vector<2x32xbf16>
      %93 = vector.shape_cast %90 : vector<2x32xbf16> to vector<1x1x2x32xbf16>
      tpu.vector_store %arg5[%c0_48, %c6_49, %c0_50, %c0_51], %93 {strides = array<i32>} : memref<1x8x2x32xbf16, #tpu.memory_space<vmem>>, vector<1x1x2x32xbf16>,
      %94 = arith.truncf %89 : vector<2x32xf32> to vector<2x32xbf16>
      %cst_52 = arith.constant dense<0.000000e+00> : vector<2x96xf32>
      %95 = tpu.matmul %94, %4, %cst_52 {dimension_numbers = #tpu.dot_dimension_numbers<[1], [0], [0], [1], [0, 0, 1, 1], [], []>} : vector<2x32xbf16>, vector<32x96xbf16>, vector<2x96xf32> -> vector<2x96xf32>
      %96 = vector.extract_strided_slice %95 {offsets = [0, 0], sizes = [2, 32], strides = [1, 1]} : vector<2x96xf32> to vector<2x32xf32>
      %97 = vector.extract_strided_slice %95 {offsets = [0, 32], sizes = [2, 32], strides = [1, 1]} : vector<2x96xf32> to vector<2x32xf32>
      %98 = vector.extract_strided_slice %95 {offsets = [0, 64], sizes = [2, 32], strides = [1, 1]} : vector<2x96xf32> to vector<2x32xf32>
      %c0_53 = arith.constant 0 : index
      %c0_54 = arith.constant 0 : index
      %c5 = arith.constant 5 : index
      %c0_55 = arith.constant 0 : index
      %c0_56 = arith.constant 0 : index
      %99 = vector.load %arg2[%c0_53, %c0_54, %c5, %c0_55, %c0_56] : memref<1x3x8x2x32xbf16, #tpu.memory_space<vmem>>, vector<1x1x1x2x32xbf16>
      %100 = vector.shape_cast %99 : vector<1x1x1x2x32xbf16> to vector<2x32xbf16>
      %101 = arith.extf %100 : vector<2x32xbf16> to vector<2x32xf32>
      %c0_57 = arith.constant 0 : index
      %c1_58 = arith.constant 1 : index
      %c5_59 = arith.constant 5 : index
      %c0_60 = arith.constant 0 : index
      %c0_61 = arith.constant 0 : index
      %102 = vector.load %arg2[%c0_57, %c1_58, %c5_59, %c0_60, %c0_61] : memref<1x3x8x2x32xbf16, #tpu.memory_space<vmem>>, vector<1x1x1x2x32xbf16>
      %103 = vector.shape_cast %102 : vector<1x1x1x2x32xbf16> to vector<2x32xbf16>
      %104 = arith.extf %103 : vector<2x32xbf16> to vector<2x32xf32>
      %c0_62 = arith.constant 0 : index
      %c2_63 = arith.constant 2 : index
      %c5_64 = arith.constant 5 : index
      %c0_65 = arith.constant 0 : index
      %c0_66 = arith.constant 0 : index
      %105 = vector.load %arg2[%c0_62, %c2_63, %c5_64, %c0_65, %c0_66] : memref<1x3x8x2x32xbf16, #tpu.memory_space<vmem>>, vector<1x1x1x2x32xbf16>
      %106 = vector.shape_cast %105 : vector<1x1x1x2x32xbf16> to vector<2x32xbf16>
      %107 = arith.extf %106 : vector<2x32xbf16> to vector<2x32xf32>
      %108 = arith.addf %101, %96 : vector<2x32xf32>
      %109 = arith.negf %108 : vector<2x32xf32>
      %110 = math.exp %109 : vector<2x32xf32>
      %cst_67 = arith.constant 1.000000e+00 : f32
      %111 = vector.broadcast %cst_67 : f32 to vector<2x32xf32>
      %112 = arith.addf %111, %110 : vector<2x32xf32>
      %113 = arith.divf %111, %112 : vector<2x32xf32>
      %114 = arith.addf %104, %97 : vector<2x32xf32>
      %115 = arith.negf %114 : vector<2x32xf32>
      %116 = math.exp %115 : vector<2x32xf32>
      %cst_68 = arith.constant 1.000000e+00 : f32
      %117 = vector.broadcast %cst_68 : f32 to vector<2x32xf32>
      %118 = arith.addf %117, %116 : vector<2x32xf32>
      %119 = arith.divf %117, %118 : vector<2x32xf32>
      %120 = arith.addf %98, %8 : vector<2x32xf32>
      %121 = arith.mulf %113, %120 : vector<2x32xf32>
      %122 = arith.addf %107, %121 : vector<2x32xf32>
      %123 = math.tanh %122 : vector<2x32xf32>
      %cst_69 = arith.constant 1.000000e+00 : f32
      %124 = vector.broadcast %cst_69 : f32 to vector<2x32xf32>
      %125 = arith.subf %124, %119 : vector<2x32xf32>
      %126 = arith.mulf %125, %123 : vector<2x32xf32>
      %127 = arith.mulf %119, %89 : vector<2x32xf32>
      %128 = arith.addf %126, %127 : vector<2x32xf32>
      %129 = arith.truncf %128 : vector<2x32xf32> to vector<2x32xbf16>
      %c0_70 = arith.constant 0 : index
      %c5_71 = arith.constant 5 : index
      %c0_72 = arith.constant 0 : index
      %c0_73 = arith.constant 0 : index
      %130 = vector.load %arg5[%c0_70, %c5_71, %c0_72, %c0_73] : memref<1x8x2x32xbf16, #tpu.memory_space<vmem>>, vector<1x1x2x32xbf16>
      %131 = vector.shape_cast %130 : vector<1x1x2x32xbf16> to vector<2x32xbf16>
      %132 = vector.shape_cast %129 : vector<2x32xbf16> to vector<1x1x2x32xbf16>
      tpu.vector_store %arg5[%c0_70, %c5_71, %c0_72, %c0_73], %132 {strides = array<i32>} : memref<1x8x2x32xbf16, #tpu.memory_space<vmem>>, vector<1x1x2x32xbf16>,
      %133 = arith.truncf %128 : vector<2x32xf32> to vector<2x32xbf16>
      %cst_74 = arith.constant dense<0.000000e+00> : vector<2x96xf32>
      %134 = tpu.matmul %133, %4, %cst_74 {dimension_numbers = #tpu.dot_dimension_numbers<[1], [0], [0], [1], [0, 0, 1, 1], [], []>} : vector<2x32xbf16>, vector<32x96xbf16>, vector<2x96xf32> -> vector<2x96xf32>
      %135 = vector.extract_strided_slice %134 {offsets = [0, 0], sizes = [2, 32], strides = [1, 1]} : vector<2x96xf32> to vector<2x32xf32>
      %136 = vector.extract_strided_slice %134 {offsets = [0, 32], sizes = [2, 32], strides = [1, 1]} : vector<2x96xf32> to vector<2x32xf32>
      %137 = vector.extract_strided_slice %134 {offsets = [0, 64], sizes = [2, 32], strides = [1, 1]} : vector<2x96xf32> to vector<2x32xf32>
      %c0_75 = arith.constant 0 : index
      %c0_76 = arith.constant 0 : index
      %c4 = arith.constant 4 : index
      %c0_77 = arith.constant 0 : index
      %c0_78 = arith.constant 0 : index
      %138 = vector.load %arg2[%c0_75, %c0_76, %c4, %c0_77, %c0_78] : memref<1x3x8x2x32xbf16, #tpu.memory_space<vmem>>, vector<1x1x1x2x32xbf16>
      %139 = vector.shape_cast %138 : vector<1x1x1x2x32xbf16> to vector<2x32xbf16>
      %140 = arith.extf %139 : vector<2x32xbf16> to vector<2x32xf32>
      %c0_79 = arith.constant 0 : index
      %c1_80 = arith.constant 1 : index
      %c4_81 = arith.constant 4 : index
      %c0_82 = arith.constant 0 : index
      %c0_83 = arith.constant 0 : index
      %141 = vector.load %arg2[%c0_79, %c1_80, %c4_81, %c0_82, %c0_83] : memref<1x3x8x2x32xbf16, #tpu.memory_space<vmem>>, vector<1x1x1x2x32xbf16>
      %142 = vector.shape_cast %141 : vector<1x1x1x2x32xbf16> to vector<2x32xbf16>
      %143 = arith.extf %142 : vector<2x32xbf16> to vector<2x32xf32>
      %c0_84 = arith.constant 0 : index
      %c2_85 = arith.constant 2 : index
      %c4_86 = arith.constant 4 : index
      %c0_87 = arith.constant 0 : index
      %c0_88 = arith.constant 0 : index
      %144 = vector.load %arg2[%c0_84, %c2_85, %c4_86, %c0_87, %c0_88] : memref<1x3x8x2x32xbf16, #tpu.memory_space<vmem>>, vector<1x1x1x2x32xbf16>
      %145 = vector.shape_cast %144 : vector<1x1x1x2x32xbf16> to vector<2x32xbf16>
      %146 = arith.extf %145 : vector<2x32xbf16> to vector<2x32xf32>
      %147 = arith.addf %140, %135 : vector<2x32xf32>
      %148 = arith.negf %147 : vector<2x32xf32>
      %149 = math.exp %148 : vector<2x32xf32>
      %cst_89 = arith.constant 1.000000e+00 : f32
      %150 = vector.broadcast %cst_89 : f32 to vector<2x32xf32>
      %151 = arith.addf %150, %149 : vector<2x32xf32>
      %152 = arith.divf %150, %151 : vector<2x32xf32>
      %153 = arith.addf %143, %136 : vector<2x32xf32>
      %154 = arith.negf %153 : vector<2x32xf32>
      %155 = math.exp %154 : vector<2x32xf32>
      %cst_90 = arith.constant 1.000000e+00 : f32
      %156 = vector.broadcast %cst_90 : f32 to vector<2x32xf32>
      %157 = arith.addf %156, %155 : vector<2x32xf32>
      %158 = arith.divf %156, %157 : vector<2x32xf32>
      %159 = arith.addf %137, %8 : vector<2x32xf32>
      %160 = arith.mulf %152, %159 : vector<2x32xf32>
      %161 = arith.addf %146, %160 : vector<2x32xf32>
      %162 = math.tanh %161 : vector<2x32xf32>
      %cst_91 = arith.constant 1.000000e+00 : f32
      %163 = vector.broadcast %cst_91 : f32 to vector<2x32xf32>
      %164 = arith.subf %163, %158 : vector<2x32xf32>
      %165 = arith.mulf %164, %162 : vector<2x32xf32>
      %166 = arith.mulf %158, %128 : vector<2x32xf32>
      %167 = arith.addf %165, %166 : vector<2x32xf32>
      %168 = arith.truncf %167 : vector<2x32xf32> to vector<2x32xbf16>
      %c0_92 = arith.constant 0 : index
      %c4_93 = arith.constant 4 : index
      %c0_94 = arith.constant 0 : index
      %c0_95 = arith.constant 0 : index
      %169 = vector.load %arg5[%c0_92, %c4_93, %c0_94, %c0_95] : memref<1x8x2x32xbf16, #tpu.memory_space<vmem>>, vector<1x1x2x32xbf16>
      %170 = vector.shape_cast %169 : vector<1x1x2x32xbf16> to vector<2x32xbf16>
      %171 = vector.shape_cast %168 : vector<2x32xbf16> to vector<1x1x2x32xbf16>
      tpu.vector_store %arg5[%c0_92, %c4_93, %c0_94, %c0_95], %171 {strides = array<i32>} : memref<1x8x2x32xbf16, #tpu.memory_space<vmem>>, vector<1x1x2x32xbf16>,
      %172 = arith.truncf %167 : vector<2x32xf32> to vector<2x32xbf16>
      %cst_96 = arith.constant dense<0.000000e+00> : vector<2x96xf32>
      %173 = tpu.matmul %172, %4, %cst_96 {dimension_numbers = #tpu.dot_dimension_numbers<[1], [0], [0], [1], [0, 0, 1, 1], [], []>} : vector<2x32xbf16>, vector<32x96xbf16>, vector<2x96xf32> -> vector<2x96xf32>
      %174 = vector.extract_strided_slice %173 {offsets = [0, 0], sizes = [2, 32], strides = [1, 1]} : vector<2x96xf32> to vector<2x32xf32>
      %175 = vector.extract_strided_slice %173 {offsets = [0, 32], sizes = [2, 32], strides = [1, 1]} : vector<2x96xf32> to vector<2x32xf32>
      %176 = vector.extract_strided_slice %173 {offsets = [0, 64], sizes = [2, 32], strides = [1, 1]} : vector<2x96xf32> to vector<2x32xf32>
      %c0_97 = arith.constant 0 : index
      %c0_98 = arith.constant 0 : index
      %c3 = arith.constant 3 : index
      %c0_99 = arith.constant 0 : index
      %c0_100 = arith.constant 0 : index
      %177 = vector.load %arg2[%c0_97, %c0_98, %c3, %c0_99, %c0_100] : memref<1x3x8x2x32xbf16, #tpu.memory_space<vmem>>, vector<1x1x1x2x32xbf16>
      %178 = vector.shape_cast %177 : vector<1x1x1x2x32xbf16> to vector<2x32xbf16>
      %179 = arith.extf %178 : vector<2x32xbf16> to vector<2x32xf32>
      %c0_101 = arith.constant 0 : index
      %c1_102 = arith.constant 1 : index
      %c3_103 = arith.constant 3 : index
      %c0_104 = arith.constant 0 : index
      %c0_105 = arith.constant 0 : index
      %180 = vector.load %arg2[%c0_101, %c1_102, %c3_103, %c0_104, %c0_105] : memref<1x3x8x2x32xbf16, #tpu.memory_space<vmem>>, vector<1x1x1x2x32xbf16>
      %181 = vector.shape_cast %180 : vector<1x1x1x2x32xbf16> to vector<2x32xbf16>
      %182 = arith.extf %181 : vector<2x32xbf16> to vector<2x32xf32>
      %c0_106 = arith.constant 0 : index
      %c2_107 = arith.constant 2 : index
      %c3_108 = arith.constant 3 : index
      %c0_109 = arith.constant 0 : index
      %c0_110 = arith.constant 0 : index
      %183 = vector.load %arg2[%c0_106, %c2_107, %c3_108, %c0_109, %c0_110] : memref<1x3x8x2x32xbf16, #tpu.memory_space<vmem>>, vector<1x1x1x2x32xbf16>
      %184 = vector.shape_cast %183 : vector<1x1x1x2x32xbf16> to vector<2x32xbf16>
      %185 = arith.extf %184 : vector<2x32xbf16> to vector<2x32xf32>
      %186 = arith.addf %179, %174 : vector<2x32xf32>
      %187 = arith.negf %186 : vector<2x32xf32>
      %188 = math.exp %187 : vector<2x32xf32>
      %cst_111 = arith.constant 1.000000e+00 : f32
      %189 = vector.broadcast %cst_111 : f32 to vector<2x32xf32>
      %190 = arith.addf %189, %188 : vector<2x32xf32>
      %191 = arith.divf %189, %190 : vector<2x32xf32>
      %192 = arith.addf %182, %175 : vector<2x32xf32>
      %193 = arith.negf %192 : vector<2x32xf32>
      %194 = math.exp %193 : vector<2x32xf32>
      %cst_112 = arith.constant 1.000000e+00 : f32
      %195 = vector.broadcast %cst_112 : f32 to vector<2x32xf32>
      %196 = arith.addf %195, %194 : vector<2x32xf32>
      %197 = arith.divf %195, %196 : vector<2x32xf32>
      %198 = arith.addf %176, %8 : vector<2x32xf32>
      %199 = arith.mulf %191, %198 : vector<2x32xf32>
      %200 = arith.addf %185, %199 : vector<2x32xf32>
      %201 = math.tanh %200 : vector<2x32xf32>
      %cst_113 = arith.constant 1.000000e+00 : f32
      %202 = vector.broadcast %cst_113 : f32 to vector<2x32xf32>
      %203 = arith.subf %202, %197 : vector<2x32xf32>
      %204 = arith.mulf %203, %201 : vector<2x32xf32>
      %205 = arith.mulf %197, %167 : vector<2x32xf32>
      %206 = arith.addf %204, %205 : vector<2x32xf32>
      %207 = arith.truncf %206 : vector<2x32xf32> to vector<2x32xbf16>
      %c0_114 = arith.constant 0 : index
      %c3_115 = arith.constant 3 : index
      %c0_116 = arith.constant 0 : index
      %c0_117 = arith.constant 0 : index
      %208 = vector.load %arg5[%c0_114, %c3_115, %c0_116, %c0_117] : memref<1x8x2x32xbf16, #tpu.memory_space<vmem>>, vector<1x1x2x32xbf16>
      %209 = vector.shape_cast %208 : vector<1x1x2x32xbf16> to vector<2x32xbf16>
      %210 = vector.shape_cast %207 : vector<2x32xbf16> to vector<1x1x2x32xbf16>
      tpu.vector_store %arg5[%c0_114, %c3_115, %c0_116, %c0_117], %210 {strides = array<i32>} : memref<1x8x2x32xbf16, #tpu.memory_space<vmem>>, vector<1x1x2x32xbf16>,
      %211 = arith.truncf %206 : vector<2x32xf32> to vector<2x32xbf16>
      %cst_118 = arith.constant dense<0.000000e+00> : vector<2x96xf32>
      %212 = tpu.matmul %211, %4, %cst_118 {dimension_numbers = #tpu.dot_dimension_numbers<[1], [0], [0], [1], [0, 0, 1, 1], [], []>} : vector<2x32xbf16>, vector<32x96xbf16>, vector<2x96xf32> -> vector<2x96xf32>
      %213 = vector.extract_strided_slice %212 {offsets = [0, 0], sizes = [2, 32], strides = [1, 1]} : vector<2x96xf32> to vector<2x32xf32>
      %214 = vector.extract_strided_slice %212 {offsets = [0, 32], sizes = [2, 32], strides = [1, 1]} : vector<2x96xf32> to vector<2x32xf32>
      %215 = vector.extract_strided_slice %212 {offsets = [0, 64], sizes = [2, 32], strides = [1, 1]} : vector<2x96xf32> to vector<2x32xf32>
      %c0_119 = arith.constant 0 : index
      %c0_120 = arith.constant 0 : index
      %c2_121 = arith.constant 2 : index
      %c0_122 = arith.constant 0 : index
      %c0_123 = arith.constant 0 : index
      %216 = vector.load %arg2[%c0_119, %c0_120, %c2_121, %c0_122, %c0_123] : memref<1x3x8x2x32xbf16, #tpu.memory_space<vmem>>, vector<1x1x1x2x32xbf16>
      %217 = vector.shape_cast %216 : vector<1x1x1x2x32xbf16> to vector<2x32xbf16>
      %218 = arith.extf %217 : vector<2x32xbf16> to vector<2x32xf32>
      %c0_124 = arith.constant 0 : index
      %c1_125 = arith.constant 1 : index
      %c2_126 = arith.constant 2 : index
      %c0_127 = arith.constant 0 : index
      %c0_128 = arith.constant 0 : index
      %219 = vector.load %arg2[%c0_124, %c1_125, %c2_126, %c0_127, %c0_128] : memref<1x3x8x2x32xbf16, #tpu.memory_space<vmem>>, vector<1x1x1x2x32xbf16>
      %220 = vector.shape_cast %219 : vector<1x1x1x2x32xbf16> to vector<2x32xbf16>
      %221 = arith.extf %220 : vector<2x32xbf16> to vector<2x32xf32>
      %c0_129 = arith.constant 0 : index
      %c2_130 = arith.constant 2 : index
      %c2_131 = arith.constant 2 : index
      %c0_132 = arith.constant 0 : index
      %c0_133 = arith.constant 0 : index
      %222 = vector.load %arg2[%c0_129, %c2_130, %c2_131, %c0_132, %c0_133] : memref<1x3x8x2x32xbf16, #tpu.memory_space<vmem>>, vector<1x1x1x2x32xbf16>
      %223 = vector.shape_cast %222 : vector<1x1x1x2x32xbf16> to vector<2x32xbf16>
      %224 = arith.extf %223 : vector<2x32xbf16> to vector<2x32xf32>
      %225 = arith.addf %218, %213 : vector<2x32xf32>
      %226 = arith.negf %225 : vector<2x32xf32>
      %227 = math.exp %226 : vector<2x32xf32>
      %cst_134 = arith.constant 1.000000e+00 : f32
      %228 = vector.broadcast %cst_134 : f32 to vector<2x32xf32>
      %229 = arith.addf %228, %227 : vector<2x32xf32>
      %230 = arith.divf %228, %229 : vector<2x32xf32>
      %231 = arith.addf %221, %214 : vector<2x32xf32>
      %232 = arith.negf %231 : vector<2x32xf32>
      %233 = math.exp %232 : vector<2x32xf32>
      %cst_135 = arith.constant 1.000000e+00 : f32
      %234 = vector.broadcast %cst_135 : f32 to vector<2x32xf32>
      %235 = arith.addf %234, %233 : vector<2x32xf32>
      %236 = arith.divf %234, %235 : vector<2x32xf32>
      %237 = arith.addf %215, %8 : vector<2x32xf32>
      %238 = arith.mulf %230, %237 : vector<2x32xf32>
      %239 = arith.addf %224, %238 : vector<2x32xf32>
      %240 = math.tanh %239 : vector<2x32xf32>
      %cst_136 = arith.constant 1.000000e+00 : f32
      %241 = vector.broadcast %cst_136 : f32 to vector<2x32xf32>
      %242 = arith.subf %241, %236 : vector<2x32xf32>
      %243 = arith.mulf %242, %240 : vector<2x32xf32>
      %244 = arith.mulf %236, %206 : vector<2x32xf32>
      %245 = arith.addf %243, %244 : vector<2x32xf32>
      %246 = arith.truncf %245 : vector<2x32xf32> to vector<2x32xbf16>
      %c0_137 = arith.constant 0 : index
      %c2_138 = arith.constant 2 : index
      %c0_139 = arith.constant 0 : index
      %c0_140 = arith.constant 0 : index
      %247 = vector.load %arg5[%c0_137, %c2_138, %c0_139, %c0_140] : memref<1x8x2x32xbf16, #tpu.memory_space<vmem>>, vector<1x1x2x32xbf16>
      %248 = vector.shape_cast %247 : vector<1x1x2x32xbf16> to vector<2x32xbf16>
      %249 = vector.shape_cast %246 : vector<2x32xbf16> to vector<1x1x2x32xbf16>
      tpu.vector_store %arg5[%c0_137, %c2_138, %c0_139, %c0_140], %249 {strides = array<i32>} : memref<1x8x2x32xbf16, #tpu.memory_space<vmem>>, vector<1x1x2x32xbf16>,
      %250 = arith.truncf %245 : vector<2x32xf32> to vector<2x32xbf16>
      %cst_141 = arith.constant dense<0.000000e+00> : vector<2x96xf32>
      %251 = tpu.matmul %250, %4, %cst_141 {dimension_numbers = #tpu.dot_dimension_numbers<[1], [0], [0], [1], [0, 0, 1, 1], [], []>} : vector<2x32xbf16>, vector<32x96xbf16>, vector<2x96xf32> -> vector<2x96xf32>
      %252 = vector.extract_strided_slice %251 {offsets = [0, 0], sizes = [2, 32], strides = [1, 1]} : vector<2x96xf32> to vector<2x32xf32>
      %253 = vector.extract_strided_slice %251 {offsets = [0, 32], sizes = [2, 32], strides = [1, 1]} : vector<2x96xf32> to vector<2x32xf32>
      %254 = vector.extract_strided_slice %251 {offsets = [0, 64], sizes = [2, 32], strides = [1, 1]} : vector<2x96xf32> to vector<2x32xf32>
      %c0_142 = arith.constant 0 : index
      %c0_143 = arith.constant 0 : index
      %c1_144 = arith.constant 1 : index
      %c0_145 = arith.constant 0 : index
      %c0_146 = arith.constant 0 : index
      %255 = vector.load %arg2[%c0_142, %c0_143, %c1_144, %c0_145, %c0_146] : memref<1x3x8x2x32xbf16, #tpu.memory_space<vmem>>, vector<1x1x1x2x32xbf16>
      %256 = vector.shape_cast %255 : vector<1x1x1x2x32xbf16> to vector<2x32xbf16>
      %257 = arith.extf %256 : vector<2x32xbf16> to vector<2x32xf32>
      %c0_147 = arith.constant 0 : index
      %c1_148 = arith.constant 1 : index
      %c1_149 = arith.constant 1 : index
      %c0_150 = arith.constant 0 : index
      %c0_151 = arith.constant 0 : index
      %258 = vector.load %arg2[%c0_147, %c1_148, %c1_149, %c0_150, %c0_151] : memref<1x3x8x2x32xbf16, #tpu.memory_space<vmem>>, vector<1x1x1x2x32xbf16>
      %259 = vector.shape_cast %258 : vector<1x1x1x2x32xbf16> to vector<2x32xbf16>
      %260 = arith.extf %259 : vector<2x32xbf16> to vector<2x32xf32>
      %c0_152 = arith.constant 0 : index
      %c2_153 = arith.constant 2 : index
      %c1_154 = arith.constant 1 : index
      %c0_155 = arith.constant 0 : index
      %c0_156 = arith.constant 0 : index
      %261 = vector.load %arg2[%c0_152, %c2_153, %c1_154, %c0_155, %c0_156] : memref<1x3x8x2x32xbf16, #tpu.memory_space<vmem>>, vector<1x1x1x2x32xbf16>
      %262 = vector.shape_cast %261 : vector<1x1x1x2x32xbf16> to vector<2x32xbf16>
      %263 = arith.extf %262 : vector<2x32xbf16> to vector<2x32xf32>
      %264 = arith.addf %257, %252 : vector<2x32xf32>
      %265 = arith.negf %264 : vector<2x32xf32>
      %266 = math.exp %265 : vector<2x32xf32>
      %cst_157 = arith.constant 1.000000e+00 : f32
      %267 = vector.broadcast %cst_157 : f32 to vector<2x32xf32>
      %268 = arith.addf %267, %266 : vector<2x32xf32>
      %269 = arith.divf %267, %268 : vector<2x32xf32>
      %270 = arith.addf %260, %253 : vector<2x32xf32>
      %271 = arith.negf %270 : vector<2x32xf32>
      %272 = math.exp %271 : vector<2x32xf32>
      %cst_158 = arith.constant 1.000000e+00 : f32
      %273 = vector.broadcast %cst_158 : f32 to vector<2x32xf32>
      %274 = arith.addf %273, %272 : vector<2x32xf32>
      %275 = arith.divf %273, %274 : vector<2x32xf32>
      %276 = arith.addf %254, %8 : vector<2x32xf32>
      %277 = arith.mulf %269, %276 : vector<2x32xf32>
      %278 = arith.addf %263, %277 : vector<2x32xf32>
      %279 = math.tanh %278 : vector<2x32xf32>
      %cst_159 = arith.constant 1.000000e+00 : f32
      %280 = vector.broadcast %cst_159 : f32 to vector<2x32xf32>
      %281 = arith.subf %280, %275 : vector<2x32xf32>
      %282 = arith.mulf %281, %279 : vector<2x32xf32>
      %283 = arith.mulf %275, %245 : vector<2x32xf32>
      %284 = arith.addf %282, %283 : vector<2x32xf32>
      %285 = arith.truncf %284 : vector<2x32xf32> to vector<2x32xbf16>
      %c0_160 = arith.constant 0 : index
      %c1_161 = arith.constant 1 : index
      %c0_162 = arith.constant 0 : index
      %c0_163 = arith.constant 0 : index
      %286 = vector.load %arg5[%c0_160, %c1_161, %c0_162, %c0_163] : memref<1x8x2x32xbf16, #tpu.memory_space<vmem>>, vector<1x1x2x32xbf16>
      %287 = vector.shape_cast %286 : vector<1x1x2x32xbf16> to vector<2x32xbf16>
      %288 = vector.shape_cast %285 : vector<2x32xbf16> to vector<1x1x2x32xbf16>
      tpu.vector_store %arg5[%c0_160, %c1_161, %c0_162, %c0_163], %288 {strides = array<i32>} : memref<1x8x2x32xbf16, #tpu.memory_space<vmem>>, vector<1x1x2x32xbf16>,
      %289 = arith.truncf %284 : vector<2x32xf32> to vector<2x32xbf16>
      %cst_164 = arith.constant dense<0.000000e+00> : vector<2x96xf32>
      %290 = tpu.matmul %289, %4, %cst_164 {dimension_numbers = #tpu.dot_dimension_numbers<[1], [0], [0], [1], [0, 0, 1, 1], [], []>} : vector<2x32xbf16>, vector<32x96xbf16>, vector<2x96xf32> -> vector<2x96xf32>
      %291 = vector.extract_strided_slice %290 {offsets = [0, 0], sizes = [2, 32], strides = [1, 1]} : vector<2x96xf32> to vector<2x32xf32>
      %292 = vector.extract_strided_slice %290 {offsets = [0, 32], sizes = [2, 32], strides = [1, 1]} : vector<2x96xf32> to vector<2x32xf32>
      %293 = vector.extract_strided_slice %290 {offsets = [0, 64], sizes = [2, 32], strides = [1, 1]} : vector<2x96xf32> to vector<2x32xf32>
      %c0_165 = arith.constant 0 : index
      %c0_166 = arith.constant 0 : index
      %c0_167 = arith.constant 0 : index
      %c0_168 = arith.constant 0 : index
      %c0_169 = arith.constant 0 : index
      %294 = vector.load %arg2[%c0_165, %c0_166, %c0_167, %c0_168, %c0_169] : memref<1x3x8x2x32xbf16, #tpu.memory_space<vmem>>, vector<1x1x1x2x32xbf16>
      %295 = vector.shape_cast %294 : vector<1x1x1x2x32xbf16> to vector<2x32xbf16>
      %296 = arith.extf %295 : vector<2x32xbf16> to vector<2x32xf32>
      %c0_170 = arith.constant 0 : index
      %c1_171 = arith.constant 1 : index
      %c0_172 = arith.constant 0 : index
      %c0_173 = arith.constant 0 : index
      %c0_174 = arith.constant 0 : index
      %297 = vector.load %arg2[%c0_170, %c1_171, %c0_172, %c0_173, %c0_174] : memref<1x3x8x2x32xbf16, #tpu.memory_space<vmem>>, vector<1x1x1x2x32xbf16>
      %298 = vector.shape_cast %297 : vector<1x1x1x2x32xbf16> to vector<2x32xbf16>
      %299 = arith.extf %298 : vector<2x32xbf16> to vector<2x32xf32>
      %c0_175 = arith.constant 0 : index
      %c2_176 = arith.constant 2 : index
      %c0_177 = arith.constant 0 : index
      %c0_178 = arith.constant 0 : index
      %c0_179 = arith.constant 0 : index
      %300 = vector.load %arg2[%c0_175, %c2_176, %c0_177, %c0_178, %c0_179] : memref<1x3x8x2x32xbf16, #tpu.memory_space<vmem>>, vector<1x1x1x2x32xbf16>
      %301 = vector.shape_cast %300 : vector<1x1x1x2x32xbf16> to vector<2x32xbf16>
      %302 = arith.extf %301 : vector<2x32xbf16> to vector<2x32xf32>
      %303 = arith.addf %296, %291 : vector<2x32xf32>
      %304 = arith.negf %303 : vector<2x32xf32>
      %305 = math.exp %304 : vector<2x32xf32>
      %cst_180 = arith.constant 1.000000e+00 : f32
      %306 = vector.broadcast %cst_180 : f32 to vector<2x32xf32>
      %307 = arith.addf %306, %305 : vector<2x32xf32>
      %308 = arith.divf %306, %307 : vector<2x32xf32>
      %309 = arith.addf %299, %292 : vector<2x32xf32>
      %310 = arith.negf %309 : vector<2x32xf32>
      %311 = math.exp %310 : vector<2x32xf32>
      %cst_181 = arith.constant 1.000000e+00 : f32
      %312 = vector.broadcast %cst_181 : f32 to vector<2x32xf32>
      %313 = arith.addf %312, %311 : vector<2x32xf32>
      %314 = arith.divf %312, %313 : vector<2x32xf32>
      %315 = arith.addf %293, %8 : vector<2x32xf32>
      %316 = arith.mulf %308, %315 : vector<2x32xf32>
      %317 = arith.addf %302, %316 : vector<2x32xf32>
      %318 = math.tanh %317 : vector<2x32xf32>
      %cst_182 = arith.constant 1.000000e+00 : f32
      %319 = vector.broadcast %cst_182 : f32 to vector<2x32xf32>
      %320 = arith.subf %319, %314 : vector<2x32xf32>
      %321 = arith.mulf %320, %318 : vector<2x32xf32>
      %322 = arith.mulf %314, %284 : vector<2x32xf32>
      %323 = arith.addf %321, %322 : vector<2x32xf32>
      %324 = arith.truncf %323 : vector<2x32xf32> to vector<2x32xbf16>
      %c0_183 = arith.constant 0 : index
      %c0_184 = arith.constant 0 : index
      %c0_185 = arith.constant 0 : index
      %c0_186 = arith.constant 0 : index
      %325 = vector.load %arg5[%c0_183, %c0_184, %c0_185, %c0_186] : memref<1x8x2x32xbf16, #tpu.memory_space<vmem>>, vector<1x1x2x32xbf16>
      %326 = vector.shape_cast %325 : vector<1x1x2x32xbf16> to vector<2x32xbf16>
      %327 = vector.shape_cast %324 : vector<2x32xbf16> to vector<1x1x2x32xbf16>
      tpu.vector_store %arg5[%c0_183, %c0_184, %c0_185, %c0_186], %327 {strides = array<i32>} : memref<1x8x2x32xbf16, #tpu.memory_space<vmem>>, vector<1x1x2x32xbf16>,
      %c0_187 = arith.constant 0 : index
      %c0_188 = arith.constant 0 : index
      %328 = vector.load %arg6[%c0_187, %c0_188] : memref<2x32xf32, #tpu.memory_space<vmem>>, vector<2x32xf32>
      tpu.vector_store %arg6[%c0_187, %c0_188], %323 {strides = array<i32>} : memref<2x32xf32, #tpu.memory_space<vmem>>, vector<2x32xf32>,
    } else {
    }
    return
  }
  func.func @transform_0(%arg0: i32, %arg1: i32) -> (i32, i32, i32, i32, i32) {
    %c2_i32 = arith.constant 2 : i32
    %0 = arith.muli %c2_i32, %arg1 : i32
    %c0_i32 = arith.constant 0 : i32
    %1 = arith.subi %c0_i32, %0 : i32
    %2 = arith.muli %arg0, %1 : i32
    %3 = arith.addi %2, %arg1 : i32
    %c0_i32_0 = arith.constant 0 : i32
    %c0_i32_1 = arith.constant 0 : i32
    %c0_i32_2 = arith.constant 0 : i32
    %c0_i32_3 = arith.constant 0 : i32
    return %arg0, %c0_i32_0, %3, %c0_i32_1, %c0_i32_2 : i32, i32, i32, i32, i32
  }
  func.func @transform_1(%arg0: i32, %arg1: i32) -> (i32, i32, i32) {
    %c0_i32 = arith.constant 0 : i32
    %c0_i32_0 = arith.constant 0 : i32
    %c0_i32_1 = arith.constant 0 : i32
    return %arg0, %c0_i32, %c0_i32_0 : i32, i32, i32
  }
  func.func @transform_2(%arg0: i32, %arg1: i32) -> (i32, i32, i32) {
    %c0_i32 = arith.constant 0 : i32
    %c0_i32_0 = arith.constant 0 : i32
    %c0_i32_1 = arith.constant 0 : i32
    return %arg0, %c0_i32, %c0_i32_0 : i32, i32, i32
  }
  func.func @transform_3(%arg0: i32, %arg1: i32) -> (i32, i32, i32, i32) {
    %c2_i32 = arith.constant 2 : i32
    %0 = arith.muli %c2_i32, %arg1 : i32
    %c0_i32 = arith.constant 0 : i32
    %1 = arith.subi %c0_i32, %0 : i32
    %2 = arith.muli %arg0, %1 : i32
    %3 = arith.addi %2, %arg1 : i32
    %c0_i32_0 = arith.constant 0 : i32
    %c0_i32_1 = arith.constant 0 : i32
    %c0_i32_2 = arith.constant 0 : i32
    return %arg0, %3, %c0_i32_0, %c0_i32_1 : i32, i32, i32, i32
  }
}

</mosaic_0001>

<bundles_post_ra>
// kernel: gru_model_forward.2
= control target key start
LH: loop header
LB: loop body
LE: loop exit
PB: predicated region body
PF: predicated region fallthrough
CT: control target
= control target key end

     0   :  { %s2598_s12 = smov 0   ;;  %s2600_s13 = smov 0   ;;  %s2970_s0 = inlined_call_operand.vmem [shape: bf16[2,3,8,2,32], index: 0, kind: input, shape index: {}]   ;;  %s2971_s1 = inlined_call_operand.vmem [shape: bf16[2,32,96], index: 1, kind: input, shape index: {}]   ;;  %s2972_s2 = inlined_call_operand.vmem [shape: f32[2,1,32], index: 2, kind: input, shape index: {}]   ;;  %s2973_s3 = inlined_call_operand.vmem [shape: bf16[2,8,2,32], index: 3, kind: output, shape index: {}]  }
   0x1   :  { %s2602_s14 = smov 0  }
   0x2 LB: > { %s25_s15 = sadd.s32 1, %s2561_s13  ;;  %p2049_p0 = scmp.ge.s32.totalorder %s2565_s14, 1  ;;  %s2565_s14 = sphi %s2602_s14, %s13_s14   ;;  %s2561_s13 = sphi %s2600_s13, %s2975_s13   ;;  %s2557_s12 = sphi %s2598_s12, %s2974_s12  }
   0x3   : > { %p27_p1 = scmp.ge.s32.totalorder %s25_s15, 2  ;;  %p199_p2 = scmp.lt.s32.totalorder %s2565_s14, 3 }
   0x5   : > { %s2977_s15 = smov (%p27_p1, %s25_s15), 0  ;;  %p200_p3 = pnand %p2049_p0, %p199_p2 }
   0x6   : > { %p250_p4 = scmp.lt.s32.totalorder (!%p200_p3), %s2557_s12, 1  ;;  %vm292_vm0 = vcmask (!%p200_p3), 254976   ;;  %v2567_v0 = vmov (!%p200_p3), 0.0   ;;  %p2054_p5 = scmp.ne.s32.totalorder (!%p200_p3), %s2557_s12, 0 }
   0x7   : > { %203 = sbr.rel (%p200_p3) target bundleno = 5880 (0x16f8), region = 32  ;;  %293 = vst.msk [vmem:[#allocation2] sm:$0x3] (!%p200_p3), %vm292_vm0, %v2567_v0 }
   0xe   : > { %s251_s16 = scalar_select %p250_p4, %s2557_s12, 1 }
   0xf   : > { %307 = sbr.rel (%p2054_p5) target bundleno = 2949 (0xb85), region = 40  ;;  %v2568_v7 = vmov (!%p2054_p5), 0.0   ;;  %vm2569_vm1 = vmmov (!%p2054_p5), 0   ;;  %v2660_v9 = vld [vmem:[#allocation2] sm:$0x3] (!%p2054_p5)  ;;  %s2570_s5 = smov (!%p2054_p5), 64   ;;  %v385_v13 = vlaneseq (!%p2054_p5) }
  0x10   : > { %s2347_s17 = smul.u32 24, %s251_s16  ;;  %s2170_s18 = sshll.u32 %s251_s16, 4  ;;  %2219 = vmatprep.subr.bf16.mxu0 (!%p2054_p5), %v2568_v7  ;;  %2223 = vmatprep.mubr.msk.bf16.mxu0 (!%p2054_p5), %vm2569_vm1, %v2568_v7  ;;  %v309_v10 = vpack.c.bf16 (!%p2054_p5), %v2660_v9, %v2660_v9  ;;  %vm322_vm2 = vcmask (!%p2054_p5), 261120   ;;  %v2571_v11 = vmov (!%p2054_p5), 1983009808   ;;  %vm422_vm3 = vcmask (!%p2054_p5), 253952  }
  0x11   : > { %s266_s21 = scalar_lea.vmem %s2971_s1, %s2170_s18  ;;  %s269_s24 = scalar_lea.vmem %s2972_s2, %s251_s16  ;;  %2227 = vmatprep.subr.bf16.mxu1 (!%p2054_p5), %v2568_v7  ;;  %2231 = vmatprep.mubr.msk.bf16.mxu1 (!%p2054_p5), %vm2569_vm1, %v2568_v7  ;;  %v383_v12 = vunpack.c.l.s4 (!%p2054_p5), %v2571_v11  ;;  %v386_v15 = vshrl.u32 (!%p2054_p5), %v385_v13, 7 }
  0x12   : > { %s2630_s27 = scalar_lea.vmem %s2970_s0, %s2347_s17  ;;  %s2052_s28 = sshll.u32 %s251_s16, 3  ;;  %v2632_v1 = vld [vmem:[%s266_s21] sm:$0xf]  ;;  %v2634_v2 = vld [vmem:[%s266_s21 + $0x4] sm:$0xf] }
  0x13   : > { %s2639_s4 = scalar_lea.vmem %s2973_s3, %s2052_s28  ;;  %v2641_v3 = vld [vmem:[%s266_s21 + $0x8] sm:$0xf]  ;;  %v2643_v4 = vld [vmem:[%s266_s21 + $0xc] sm:$0xf]  ;;  %v2645_v5 = vld [vmem:[%s269_s24] ss:$0 sm:$0xff]  ;;  %v2650_v6 = vcombine.low (!%p2054_p5), %v2632_v1, %v2634_v2  ;;  %v384_v14 = vunpack.c.0.s8 (!%p2054_p5), %v383_v12 }
  0x14   : > { %v2658_v8 = vcombine.low (!%p2054_p5), %v2641_v3, %v2643_v4  ;;  %399 = vrot.lane.b32.xlu0 (!%p2054_p5), %v2645_v5, %s2570_s5  ;;  %s2572_s6 = smov (!%p2054_p5), 96   ;;  %v366_v25 = vld [vmem:[%s2630_s27] sm:$0x1] (!%p2054_p5)  ;;  %v2058_v30 = vld [vmem:[%s2630_s27 + $0x8] sm:$0x1] (!%p2054_p5) }
  0x15   : > { %2220 = vmatpush3.bf16.msra.mxu0 (!%p2054_p5), %v2650_v6  ;;  %2228 = vmatpush3.bf16.msra.mxu1 (!%p2054_p5), %v2650_v6  ;;  %v2683_v16 = vsub.s32 (!%p2054_p5), %v384_v14, %v386_v15  ;;  %v367_v26 = vunpack.c.l.bf16 (!%p2054_p5), %v366_v25  ;;  %v370_v32 = vunpack.c.l.bf16 (!%p2054_p5), %v2058_v30  ;;  %v2059_v36 = vld [vmem:[%s2630_s27 + $0x10] sm:$0x1] (!%p2054_p5)  ;;  %v2063_v58 = vld [vmem:[%s2630_s27 + $0x1] sm:$0x1] (!%p2054_p5)  ;;  %v2064_v63 = vld [vmem:[%s2630_s27 + $0x9] sm:$0x1] (!%p2054_p5) }
  0x16   : > { %2221 = vmatprep.subr.bf16.mxu0 %v2568_v7  ;;  %2229 = vmatprep.subr.bf16.mxu1 %v2568_v7  ;;  %v373_v39 = vunpack.c.l.bf16 %v2059_v36  ;;  %v469_v59 = vunpack.c.l.bf16 %v2063_v58  ;;  %v2065_v13 = vld [vmem:[%s2630_s27 + $0x11] sm:$0x1] }
  0x19   : > { %2222 = vmatpush3.bf16.msra.mxu0 %v2658_v8  ;;  %2230 = vmatpush3.bf16.msra.mxu1 %v2658_v8 }
  0x1a   : > { %2235 = vmatprep.subr.bf16.mxu0 %v2568_v7  ;;  %2243 = vmatprep.subr.bf16.mxu1 %v2568_v7 }
  0x1c   : > { %2224 = vmatmul.mubr.msk.bf16.vlgmr.msra.gmra.mrb[0].mxu0 %vm322_vm2, %v309_v10 }
  0x1d   : > { %2236 = vmatpush3.bf16.msra.mxu0 %v2650_v6  ;;  %2239 = vmatprep.mubr.msk.bf16.mxu0 %vm2569_vm1, %v2568_v7 }
  0x1e   : > { %2237 = vmatprep.subr.bf16.mxu0 %v2568_v7 }
  0x21   : > { %2238 = vmatpush3.bf16.msra.mxu0 %v2658_v8 }
  0x22   : > { %2251 = vmatprep.subr.bf16.mxu0 %v2568_v7 }
  0x86   : > { %v2685_v17 = vpop.permute.xlu0 %399 }
  0xef   : > { %v360_v18 = vpop.f32.mrb[0].mxu0 }
  0xf0   : > { %v388_v19 = vrot.slane %v360_v18, %v2683_v16  ;;  %v2225_v20 = vpop.f32.mrb[1].mxu0  ;;  %v402_v21 = vadd.f32 %v2685_v17, %v360_v18  ;;  %v374_v27 = vadd.f32 %v367_v26, %v360_v18  ;;  %v475_v18 = vunpack.c.l.bf16 %v2065_v13 }
  0xf1   : > { %v363_v22 = vpop.f32.mrb[2].mxu0 }
  0xf2   : > { %389 = vrot.lane.b32.xlu0 %v388_v19, %s2572_s6  ;;  %v2226_v23 = vpop.f32.mrb[3].mxu0  ;;  %v410_v24 = vrot.slane %v402_v21, %v2683_v16  ;;  %v2060_v28 = vmul.f32 -1.442695, %v374_v27 }
  0xf4   : > { %411 = vrot.lane.b32.xlu1 %v410_v24, %s2570_s5  ;;  %2383 = vpow2.f32 %v2060_v28 }
  0xfe   : > { %v2384_v29 = vpop.eup %2383 }
  0xff   : > { %v378_v31 = vadd.f32 1.0, %v2384_v29 }
 0x101   : > { %2385 = vrcp.f32 %v378_v31 }
 0x10b   : > { %v2386_v38 = vpop.eup %2385 }
 0x164   : > { %v390_v33 = vpop.permute.xlu0 %389 }
 0x165   : > { %v392_v34 = vadd.f32 %v390_v33, %v370_v32 }
 0x166   : > { %v412_v37 = vpop.permute.xlu1 %411 }
 0x167   : > { %v2061_v35 = vmul.f32 -1.442695, %v392_v34  ;;  %v414_v40 = vmul.f32 %v2386_v38, %v412_v37  ;;  %v2070_v37 = vld [vmem:[%s2630_s27 + $0x2] sm:$0x1] }
 0x168   : > { %v568_v38 = vunpack.c.l.bf16 %v2070_v37 }
 0x169   : > { %2387 = vpow2.f32 %v2061_v35  ;;  %v415_v43 = vadd.f32 %v414_v40, %v373_v39 }
 0x173   : > { %v2388_v41 = vpop.eup %2387 }
 0x174   : > { %v396_v42 = vadd.f32 1.0, %v2388_v41 }
 0x176   : > { %2389 = vrcp.f32 %v396_v42  ;;  %v2071_v42 = vld [vmem:[%s2630_s27 + $0xa] sm:$0x1] }
 0x177   : > { %2391 = vtanh.f32 %v415_v43 }
 0x180   : > { %v2390_v44 = vpop.eup %2389 }
 0x181   : > { %v417_v45 = vsub.f32 1.0, %v2390_v44  ;;  %v2392_v46 = vpop.eup %2391  ;;  %v419_v48 = vmul.f32 %v2390_v44, %v2660_v9  ;;  %v472_v9 = vunpack.c.l.bf16 %v2064_v63  ;;  %v571_v44 = vunpack.c.l.bf16 %v2071_v42 }
 0x183   : > { %v418_v47 = vmul.f32 %v2392_v46, %v417_v45 }
 0x185   : > { %v420_v49 = vadd.f32 %v419_v48, %v418_v47  ;;  %v2072_v48 = vld [vmem:[%s2630_s27 + $0x12] sm:$0x1] }
 0x187   : > { %v421_v50 = vpack.c.bf16 %v420_v49, %v420_v49 }
 0x189   : > { %423 = vst.msk [vmem:[%s2639_s4] sm:$0x1] %vm422_vm3, %v421_v50  ;;  %2232 = vmatmul.mubr.msk.bf16.vlgmr.msra.gmra.mrb[0].mxu1 %vm322_vm2, %v421_v50 }
 0x18a   : > { %2244 = vmatpush3.bf16.msra.mxu1 %v2650_v6  ;;  %2247 = vmatprep.mubr.msk.bf16.mxu1 %vm2569_vm1, %v2568_v7 }
 0x18b   : > { %2245 = vmatprep.subr.bf16.mxu1 %v2568_v7 }
 0x18e   : > { %2246 = vmatpush3.bf16.msra.mxu1 %v2658_v8 }
 0x18f   : > { %2259 = vmatprep.subr.bf16.mxu1 %v2568_v7 }
 0x25c   : > { %v461_v51 = vpop.f32.mrb[0].mxu1 }
 0x25d   : > { %v490_v52 = vrot.slane %v461_v51, %v2683_v16  ;;  %v501_v53 = vadd.f32 %v461_v51, %v2685_v17  ;;  %v2233_v54 = vpop.f32.mrb[1].mxu1  ;;  %v476_v60 = vadd.f32 %v469_v59, %v461_v51  ;;  %v574_v51 = vunpack.c.l.bf16 %v2072_v48 }
 0x25e   : > { %v464_v55 = vpop.f32.mrb[2].mxu1 }
 0x25f   : > { %491 = vrot.lane.b32.xlu1 %v490_v52, %s2572_s6  ;;  %v2234_v56 = vpop.f32.mrb[3].mxu1  ;;  %v509_v57 = vrot.slane %v501_v53, %v2683_v16  ;;  %v2066_v61 = vmul.f32 -1.442695, %v476_v60 }
 0x261   : > { %510 = vrot.lane.b32.xlu0 %v509_v57, %s2570_s5  ;;  %2393 = vpow2.f32 %v2066_v61 }
 0x26b   : > { %v2394_v62 = vpop.eup %2393 }
 0x26c   : > { %v480_v0 = vadd.f32 1.0, %v2394_v62 }
 0x26e   : > { %2395 = vrcp.f32 %v480_v0 }
 0x278   : > { %v2396_v15 = vpop.eup %2395 }
 0x2d1   : > { %v492_v10 = vpop.permute.xlu1 %491 }
 0x2d2   : > { %v494_v11 = vadd.f32 %v492_v10, %v472_v9 }
 0x2d3   : > { %v511_v14 = vpop.permute.xlu0 %510 }
 0x2d4   : > { %v2067_v12 = vmul.f32 -1.442695, %v494_v11  ;;  %v513_v19 = vmul.f32 %v2396_v15, %v511_v14  ;;  %v2077_v14 = vld [vmem:[%s2630_s27 + $0x3] sm:$0x1] }
 0x2d5   : > { %v667_v15 = vunpack.c.l.bf16 %v2077_v14 }
 0x2d6   : > { %2397 = vpow2.f32 %v2067_v12  ;;  %v514_v22 = vadd.f32 %v513_v19, %v475_v18 }
 0x2e0   : > { %v2398_v20 = vpop.eup %2397 }
 0x2e1   : > { %v498_v21 = vadd.f32 1.0, %v2398_v20 }
 0x2e3   : > { %2399 = vrcp.f32 %v498_v21  ;;  %v2078_v21 = vld [vmem:[%s2630_s27 + $0xb] sm:$0x1] }
 0x2e4   : > { %2401 = vtanh.f32 %v514_v22 }
 0x2ed   : > { %v2400_v23 = vpop.eup %2399 }
 0x2ee   : > { %v516_v24 = vsub.f32 1.0, %v2400_v23  ;;  %v2402_v25 = vpop.eup %2401  ;;  %v518_v26 = vmul.f32 %v2400_v23, %v420_v49  ;;  %v670_v23 = vunpack.c.l.bf16 %v2078_v21 }
 0x2f0   : > { %v517_v27 = vmul.f32 %v2402_v25, %v516_v24 }
 0x2f2   : > { %v519_v28 = vadd.f32 %v518_v26, %v517_v27  ;;  %v2079_v27 = vld [vmem:[%s2630_s27 + $0x13] sm:$0x1] }
 0x2f4   : > { %v520_v29 = vpack.c.bf16 %v519_v28, %v519_v28 }
 0x2f6   : > { %2068 = vst.msk [vmem:[%s2639_s4 + $0x1] sm:$0x1] %vm422_vm3, %v520_v29  ;;  %2240 = vmatmul.mubr.msk.bf16.vlgmr.msra.gmra.mrb[4].mxu0 %vm322_vm2, %v520_v29 }
 0x2f7   : > { %2252 = vmatpush3.bf16.msra.mxu0 %v2650_v6  ;;  %2255 = vmatprep.mubr.msk.bf16.mxu0 %vm2569_vm1, %v2568_v7 }
 0x2f8   : > { %2253 = vmatprep.subr.bf16.mxu0 %v2568_v7 }
 0x2fb   : > { %2254 = vmatpush3.bf16.msra.mxu0 %v2658_v8 }
 0x2fc   : > { %2267 = vmatprep.subr.bf16.mxu0 %v2568_v7 }
 0x3c9   : > { %v560_v30 = vpop.f32.mrb[4].mxu0 }
 0x3ca   : > { %v589_v31 = vrot.slane %v560_v30, %v2683_v16  ;;  %v600_v32 = vadd.f32 %v560_v30, %v2685_v17  ;;  %v2241_v33 = vpop.f32.mrb[5].mxu0  ;;  %v575_v39 = vadd.f32 %v568_v38, %v560_v30  ;;  %v673_v30 = vunpack.c.l.bf16 %v2079_v27  ;;  %v2091_v27 = vld [vmem:[%s2630_s27 + $0x5] sm:$0x1] }
 0x3cb   : > { %v563_v34 = vpop.f32.mrb[6].mxu0 }
 0x3cc   : > { %590 = vrot.lane.b32.xlu1 %v589_v31, %s2572_s6  ;;  %v2242_v35 = vpop.f32.mrb[7].mxu0  ;;  %v608_v36 = vrot.slane %v600_v32, %v2683_v16  ;;  %v2073_v40 = vmul.f32 -1.442695, %v575_v39 }
 0x3ce   : > { %609 = vrot.lane.b32.xlu0 %v608_v36, %s2570_s5  ;;  %2403 = vpow2.f32 %v2073_v40 }
 0x3d8   : > { %v2404_v41 = vpop.eup %2403 }
 0x3d9   : > { %v579_v43 = vadd.f32 1.0, %v2404_v41 }
 0x3db   : > { %2405 = vrcp.f32 %v579_v43 }
 0x3e5   : > { %v2406_v50 = vpop.eup %2405 }
 0x43e   : > { %v591_v45 = vpop.permute.xlu1 %590 }
 0x43f   : > { %v593_v46 = vadd.f32 %v591_v45, %v571_v44 }
 0x440   : > { %v610_v49 = vpop.permute.xlu0 %609 }
 0x441   : > { %v2074_v47 = vmul.f32 -1.442695, %v593_v46  ;;  %v612_v52 = vmul.f32 %v2406_v50, %v610_v49  ;;  %v2084_v49 = vld [vmem:[%s2630_s27 + $0x4] sm:$0x1] }
 0x442   : > { %v766_v50 = vunpack.c.l.bf16 %v2084_v49 }
 0x443   : > { %2407 = vpow2.f32 %v2074_v47  ;;  %v613_v55 = vadd.f32 %v612_v52, %v574_v51 }
 0x44d   : > { %v2408_v53 = vpop.eup %2407 }
 0x44e   : > { %v597_v54 = vadd.f32 1.0, %v2408_v53 }
 0x450   : > { %2409 = vrcp.f32 %v597_v54  ;;  %v2085_v54 = vld [vmem:[%s2630_s27 + $0xc] sm:$0x1] }
 0x451   : > { %2411 = vtanh.f32 %v613_v55 }
 0x45a   : > { %v2410_v56 = vpop.eup %2409 }
 0x45b   : > { %v615_v57 = vsub.f32 1.0, %v2410_v56  ;;  %v2412_v58 = vpop.eup %2411  ;;  %v617_v59 = vmul.f32 %v2410_v56, %v519_v28  ;;  %v769_v56 = vunpack.c.l.bf16 %v2085_v54 }
 0x45d   : > { %v616_v60 = vmul.f32 %v2412_v58, %v615_v57 }
 0x45f   : > { %v618_v61 = vadd.f32 %v617_v59, %v616_v60  ;;  %v2086_v60 = vld [vmem:[%s2630_s27 + $0x14] sm:$0x1] }
 0x461   : > { %v619_v62 = vpack.c.bf16 %v618_v61, %v618_v61 }
 0x463   : > { %2075 = vst.msk [vmem:[%s2639_s4 + $0x2] sm:$0x1] %vm422_vm3, %v619_v62  ;;  %2248 = vmatmul.mubr.msk.bf16.vlgmr.msra.gmra.mrb[4].mxu1 %vm322_vm2, %v619_v62 }
 0x464   : > { %2260 = vmatpush3.bf16.msra.mxu1 %v2650_v6  ;;  %2263 = vmatprep.mubr.msk.bf16.mxu1 %vm2569_vm1, %v2568_v7 }
 0x465   : > { %2261 = vmatprep.subr.bf16.mxu1 %v2568_v7 }
 0x468   : > { %2262 = vmatpush3.bf16.msra.mxu1 %v2658_v8 }
 0x469   : > { %2275 = vmatprep.subr.bf16.mxu1 %v2568_v7 }
 0x536   : > { %v659_v63 = vpop.f32.mrb[4].mxu1 }
 0x537   : > { %v688_v0 = vrot.slane %v659_v63, %v2683_v16  ;;  %v699_v9 = vadd.f32 %v659_v63, %v2685_v17  ;;  %v2249_v10 = vpop.f32.mrb[5].mxu1  ;;  %v674_v18 = vadd.f32 %v667_v15, %v659_v63  ;;  %v772_v63 = vunpack.c.l.bf16 %v2086_v60 }
 0x538   : > { %v662_v11 = vpop.f32.mrb[6].mxu1 }
 0x539   : > { %689 = vrot.lane.b32.xlu1 %v688_v0, %s2572_s6  ;;  %v2250_v12 = vpop.f32.mrb[7].mxu1  ;;  %v707_v13 = vrot.slane %v699_v9, %v2683_v16  ;;  %v2080_v19 = vmul.f32 -1.442695, %v674_v18 }
 0x53b   : > { %708 = vrot.lane.b32.xlu0 %v707_v13, %s2570_s5  ;;  %2413 = vpow2.f32 %v2080_v19 }
 0x545   : > { %v2414_v20 = vpop.eup %2413 }
 0x546   : > { %v678_v22 = vadd.f32 1.0, %v2414_v20 }
 0x548   : > { %2415 = vrcp.f32 %v678_v22 }
 0x552   : > { %v2416_v29 = vpop.eup %2415 }
 0x5ab   : > { %v690_v24 = vpop.permute.xlu1 %689 }
 0x5ac   : > { %v692_v25 = vadd.f32 %v690_v24, %v670_v23 }
 0x5ad   : > { %v709_v28 = vpop.permute.xlu0 %708 }
 0x5ae   : > { %v2081_v26 = vmul.f32 -1.442695, %v692_v25  ;;  %v711_v31 = vmul.f32 %v2416_v29, %v709_v28 }
 0x5b0   : > { %2417 = vpow2.f32 %v2081_v26  ;;  %v712_v34 = vadd.f32 %v711_v31, %v673_v30  ;;  %v2092_v30 = vld [vmem:[%s2630_s27 + $0xd] sm:$0x1] }
 0x5ba   : > { %v2418_v32 = vpop.eup %2417 }
 0x5bb   : > { %v696_v33 = vadd.f32 1.0, %v2418_v32  ;;  %v868_v32 = vunpack.c.l.bf16 %v2092_v30 }
 0x5bd   : > { %2419 = vrcp.f32 %v696_v33 }
 0x5be   : > { %2421 = vtanh.f32 %v712_v34 }
 0x5c7   : > { %v2420_v35 = vpop.eup %2419 }
 0x5c8   : > { %v714_v36 = vsub.f32 1.0, %v2420_v35  ;;  %v2422_v37 = vpop.eup %2421  ;;  %v716_v38 = vmul.f32 %v2420_v35, %v618_v61 }
 0x5ca   : > { %v715_v39 = vmul.f32 %v2422_v37, %v714_v36  ;;  %v2093_v36 = vld [vmem:[%s2630_s27 + $0x15] sm:$0x1] }
 0x5cc   : > { %v717_v40 = vadd.f32 %v716_v38, %v715_v39  ;;  %v871_v39 = vunpack.c.l.bf16 %v2093_v36 }
 0x5ce   : > { %v718_v41 = vpack.c.bf16 %v717_v40, %v717_v40 }
 0x5d0   : > { %2082 = vst.msk [vmem:[%s2639_s4 + $0x3] sm:$0x1] %vm422_vm3, %v718_v41  ;;  %2256 = vmatmul.mubr.msk.bf16.vlgmr.msra.gmra.mrb[8].mxu0 %vm322_vm2, %v718_v41 }
 0x5d1   : > { %2268 = vmatpush3.bf16.msra.mxu0 %v2650_v6  ;;  %2271 = vmatprep.mubr.msk.bf16.mxu0 %vm2569_vm1, %v2568_v7 }
 0x5d2   : > { %2269 = vmatprep.subr.bf16.mxu0 %v2568_v7 }
 0x5d5   : > { %2270 = vmatpush3.bf16.msra.mxu0 %v2658_v8 }
 0x6a3   : > { %v758_v42 = vpop.f32.mrb[8].mxu0 }
 0x6a4   : > { %v787_v43 = vrot.slane %v758_v42, %v2683_v16  ;;  %v798_v44 = vadd.f32 %v758_v42, %v2685_v17  ;;  %v2257_v45 = vpop.f32.mrb[9].mxu0  ;;  %v773_v51 = vadd.f32 %v766_v50, %v758_v42 }
 0x6a5   : > { %v761_v46 = vpop.f32.mrb[10].mxu0 }
 0x6a6   : > { %788 = vrot.lane.b32.xlu1 %v787_v43, %s2572_s6  ;;  %v2258_v47 = vpop.f32.mrb[11].mxu0  ;;  %v806_v48 = vrot.slane %v798_v44, %v2683_v16  ;;  %v2087_v52 = vmul.f32 -1.442695, %v773_v51 }
 0x6a8   : > { %807 = vrot.lane.b32.xlu0 %v806_v48, %s2570_s5  ;;  %2423 = vpow2.f32 %v2087_v52 }
 0x6b2   : > { %v2424_v53 = vpop.eup %2423 }
 0x6b3   : > { %v777_v55 = vadd.f32 1.0, %v2424_v53 }
 0x6b5   : > { %2425 = vrcp.f32 %v777_v55 }
 0x6bf   : > { %v2426_v62 = vpop.eup %2425 }
 0x718   : > { %v789_v57 = vpop.permute.xlu1 %788 }
 0x719   : > { %v791_v58 = vadd.f32 %v789_v57, %v769_v56 }
 0x71a   : > { %v808_v61 = vpop.permute.xlu0 %807 }
 0x71b   : > { %v2088_v59 = vmul.f32 -1.442695, %v791_v58  ;;  %v810_v0 = vmul.f32 %v2426_v62, %v808_v61  ;;  %v2098_v58 = vld [vmem:[%s2630_s27 + $0x6] sm:$0x1] }
 0x71d   : > { %2427 = vpow2.f32 %v2088_v59  ;;  %v811_v11 = vadd.f32 %v810_v0, %v772_v63  ;;  %v964_v59 = vunpack.c.l.bf16 %v2098_v58  ;;  %v2099_v63 = vld [vmem:[%s2630_s27 + $0xe] sm:$0x1] }
 0x727   : > { %v2428_v9 = vpop.eup %2427 }
 0x728   : > { %v795_v10 = vadd.f32 1.0, %v2428_v9  ;;  %v967_v9 = vunpack.c.l.bf16 %v2099_v63 }
 0x72a   : > { %2429 = vrcp.f32 %v795_v10 }
 0x72b   : > { %2431 = vtanh.f32 %v811_v11 }
 0x734   : > { %v2430_v12 = vpop.eup %2429 }
 0x735   : > { %v813_v13 = vsub.f32 1.0, %v2430_v12  ;;  %v2432_v14 = vpop.eup %2431  ;;  %v815_v15 = vmul.f32 %v2430_v12, %v717_v40 }
 0x737   : > { %v814_v18 = vmul.f32 %v2432_v14, %v813_v13  ;;  %v2100_v13 = vld [vmem:[%s2630_s27 + $0x16] sm:$0x1] }
 0x739   : > { %v816_v19 = vadd.f32 %v815_v15, %v814_v18  ;;  %v970_v18 = vunpack.c.l.bf16 %v2100_v13 }
 0x73b   : > { %v817_v20 = vpack.c.bf16 %v816_v19, %v816_v19 }
 0x73d   : > { %2089 = vst.msk [vmem:[%s2639_s4 + $0x4] sm:$0x1] %vm422_vm3, %v817_v20  ;;  %2264 = vmatmul.mubr.msk.bf16.vlgmr.msra.gmra.mrb[8].mxu1 %vm322_vm2, %v817_v20 }
 0x73e   : > { %2276 = vmatpush3.bf16.msra.mxu1 %v2650_v6  ;;  %2279 = vmatprep.mubr.msk.bf16.mxu1 %vm2569_vm1, %v2568_v7 }
 0x73f   : > { %2277 = vmatprep.subr.bf16.mxu1 %v2568_v7  ;;  %v865_v7 = vunpack.c.l.bf16 %v2091_v27 }
 0x742   : > { %2278 = vmatpush3.bf16.msra.mxu1 %v2658_v8 }
 0x810   : > { %v857_v21 = vpop.f32.mrb[8].mxu1 }
 0x811   : > { %v886_v22 = vrot.slane %v857_v21, %v2683_v16  ;;  %v897_v23 = vadd.f32 %v857_v21, %v2685_v17  ;;  %v2265_v24 = vpop.f32.mrb[9].mxu1  ;;  %v872_v28 = vadd.f32 %v865_v7, %v857_v21 }
 0x812   : > { %v860_v25 = vpop.f32.mrb[10].mxu1 }
 0x813   : > { %887 = vrot.lane.b32.xlu1 %v886_v22, %s2572_s6  ;;  %v2266_v26 = vpop.f32.mrb[11].mxu1  ;;  %v905_v6 = vrot.slane %v897_v23, %v2683_v16  ;;  %v2094_v8 = vmul.f32 -1.442695, %v872_v28 }
 0x815   : > { %906 = vrot.lane.b32.xlu0 %v905_v6, %s2570_s5  ;;  %2433 = vpow2.f32 %v2094_v8 }
 0x81f   : > { %v2434_v29 = vpop.eup %2433 }
 0x820   : > { %v876_v31 = vadd.f32 1.0, %v2434_v29 }
 0x822   : > { %2435 = vrcp.f32 %v876_v31 }
 0x82c   : > { %v2436_v38 = vpop.eup %2435 }
 0x885   : > { %v888_v33 = vpop.permute.xlu1 %887 }
 0x886   : > { %v890_v34 = vadd.f32 %v888_v33, %v868_v32 }
 0x887   : > { %v907_v37 = vpop.permute.xlu0 %906 }
 0x888   : > { %v2095_v35 = vmul.f32 -1.442695, %v890_v34  ;;  %v909_v40 = vmul.f32 %v2436_v38, %v907_v37  ;;  %v2105_v34 = vld [vmem:[%s2630_s27 + $0x7] sm:$0x1] }
 0x88a   : > { %2437 = vpow2.f32 %v2095_v35  ;;  %v910_v43 = vadd.f32 %v909_v40, %v871_v39  ;;  %v1063_v35 = vunpack.c.l.bf16 %v2105_v34  ;;  %v2106_v39 = vld [vmem:[%s2630_s27 + $0xf] sm:$0x1] }
 0x894   : > { %v2438_v41 = vpop.eup %2437 }
 0x895   : > { %v894_v42 = vadd.f32 1.0, %v2438_v41  ;;  %v1066_v41 = vunpack.c.l.bf16 %v2106_v39 }
 0x897   : > { %2439 = vrcp.f32 %v894_v42 }
 0x898   : > { %2441 = vtanh.f32 %v910_v43 }
 0x8a1   : > { %v2440_v44 = vpop.eup %2439 }
 0x8a2   : > { %v912_v45 = vsub.f32 1.0, %v2440_v44  ;;  %v2442_v46 = vpop.eup %2441  ;;  %v914_v47 = vmul.f32 %v2440_v44, %v816_v19  ;;  %v2107_v44 = vld [vmem:[%s2630_s27 + $0x17] sm:$0x1] }
 0x8a4   : > { %v913_v48 = vmul.f32 %v2442_v46, %v912_v45  ;;  %v1069_v46 = vunpack.c.l.bf16 %v2107_v44 }
 0x8a6   : > { %v915_v49 = vadd.f32 %v914_v47, %v913_v48 }
 0x8a8   : > { %v916_v50 = vpack.c.bf16 %v915_v49, %v915_v49 }
 0x8aa   : > { %2096 = vst.msk [vmem:[%s2639_s4 + $0x5] sm:$0x1] %vm422_vm3, %v916_v50  ;;  %2272 = vmatmul.mubr.msk.bf16.vlgmr.msra.gmra.mrb[12].mxu0 %vm322_vm2, %v916_v50 }
 0x97d   : > { %v956_v51 = vpop.f32.mrb[12].mxu0 }
 0x97e   : > { %v985_v52 = vrot.slane %v956_v51, %v2683_v16  ;;  %v996_v53 = vadd.f32 %v956_v51, %v2685_v17  ;;  %v2273_v54 = vpop.f32.mrb[13].mxu0  ;;  %v971_v60 = vadd.f32 %v964_v59, %v956_v51 }
 0x97f   : > { %v959_v55 = vpop.f32.mrb[14].mxu0 }
 0x980   : > { %986 = vrot.lane.b32.xlu1 %v985_v52, %s2572_s6  ;;  %v2274_v56 = vpop.f32.mrb[15].mxu0  ;;  %v1004_v57 = vrot.slane %v996_v53, %v2683_v16  ;;  %v2101_v61 = vmul.f32 -1.442695, %v971_v60 }
 0x982   : > { %1005 = vrot.lane.b32.xlu0 %v1004_v57, %s2570_s5  ;;  %2443 = vpow2.f32 %v2101_v61 }
 0x98c   : > { %v2444_v62 = vpop.eup %2443 }
 0x98d   : > { %v975_v0 = vadd.f32 1.0, %v2444_v62 }
 0x98f   : > { %2445 = vrcp.f32 %v975_v0 }
 0x999   : > { %v2446_v15 = vpop.eup %2445 }
 0x9f2   : > { %v987_v10 = vpop.permute.xlu1 %986 }
 0x9f3   : > { %v989_v11 = vadd.f32 %v987_v10, %v967_v9 }
 0x9f4   : > { %v1006_v14 = vpop.permute.xlu0 %1005 }
 0x9f5   : > { %v2102_v12 = vmul.f32 -1.442695, %v989_v11  ;;  %v1008_v19 = vmul.f32 %v2446_v15, %v1006_v14 }
 0x9f7   : > { %2447 = vpow2.f32 %v2102_v12  ;;  %v1009_v22 = vadd.f32 %v1008_v19, %v970_v18 }
 0xa01   : > { %v2448_v20 = vpop.eup %2447 }
 0xa02   : > { %v993_v21 = vadd.f32 1.0, %v2448_v20 }
 0xa04   : > { %2449 = vrcp.f32 %v993_v21 }
 0xa05   : > { %2451 = vtanh.f32 %v1009_v22 }
 0xa0e   : > { %v2450_v23 = vpop.eup %2449 }
 0xa0f   : > { %v1011_v24 = vsub.f32 1.0, %v2450_v23  ;;  %v2452_v25 = vpop.eup %2451  ;;  %v1013_v26 = vmul.f32 %v2450_v23, %v915_v49 }
 0xa11   : > { %v1012_v6 = vmul.f32 %v2452_v25, %v1011_v24 }
 0xa13   : > { %v1014_v27 = vadd.f32 %v1013_v26, %v1012_v6 }
 0xa15   : > { %v1015_v7 = vpack.c.bf16 %v1014_v27, %v1014_v27 }
 0xa17   : > { %2103 = vst.msk [vmem:[%s2639_s4 + $0x6] sm:$0x1] %vm422_vm3, %v1015_v7  ;;  %2280 = vmatmul.mubr.msk.bf16.vlgmr.msra.gmra.mrb[12].mxu1 %vm322_vm2, %v1015_v7 }
 0xaea   : > { %v1055_v28 = vpop.f32.mrb[12].mxu1 }
 0xaeb   : > { %v1084_v8 = vrot.slane %v1055_v28, %v2683_v16  ;;  %v1095_v29 = vadd.f32 %v1055_v28, %v2685_v17  ;;  %v2281_v30 = vpop.f32.mrb[13].mxu1  ;;  %v1070_v36 = vadd.f32 %v1063_v35, %v1055_v28 }
 0xaec   : > { %v1058_v31 = vpop.f32.mrb[14].mxu1 }
 0xaed   : > { %1085 = vrot.lane.b32.xlu1 %v1084_v8, %s2572_s6  ;;  %v2282_v32 = vpop.f32.mrb[15].mxu1  ;;  %v1103_v33 = vrot.slane %v1095_v29, %v2683_v16  ;;  %v2108_v37 = vmul.f32 -1.442695, %v1070_v36 }
 0xaef   : > { %1104 = vrot.lane.b32.xlu0 %v1103_v33, %s2570_s5  ;;  %2453 = vpow2.f32 %v2108_v37 }
 0xaf9   : > { %v2454_v38 = vpop.eup %2453 }
 0xafa   : > { %v1074_v40 = vadd.f32 1.0, %v2454_v38 }
 0xafc   : > { %2455 = vrcp.f32 %v1074_v40 }
 0xb06   : > { %v2456_v16 = vpop.eup %2455 }
 0xb5f   : > { %v1086_v17 = vpop.permute.xlu1 %1085 }
 0xb60   : > { %v1088_v42 = vadd.f32 %v1086_v17, %v1066_v41 }
 0xb61   : > { %v1105_v45 = vpop.permute.xlu0 %1104 }
 0xb62   : > { %v2109_v43 = vmul.f32 -1.442695, %v1088_v42  ;;  %v1107_v47 = vmul.f32 %v2456_v16, %v1105_v45 }
 0xb64   : > { %2457 = vpow2.f32 %v2109_v43  ;;  %v1108_v50 = vadd.f32 %v1107_v47, %v1069_v46 }
 0xb6e   : > { %v2458_v48 = vpop.eup %2457 }
 0xb6f   : > { %v1092_v49 = vadd.f32 1.0, %v2458_v48 }
 0xb71   : > { %2459 = vrcp.f32 %v1092_v49 }
 0xb72   : > { %2461 = vtanh.f32 %v1108_v50 }
 0xb7b   : > { %v2460_v51 = vpop.eup %2459 }
 0xb7c   : > { %v1110_v52 = vsub.f32 1.0, %v2460_v51  ;;  %v2462_v53 = vpop.eup %2461  ;;  %v1112_v54 = vmul.f32 %v2460_v51, %v1014_v27 }
 0xb7e   : > { %v1111_v55 = vmul.f32 %v2462_v53, %v1110_v52 }
 0xb80   : > { %v1113_v56 = vadd.f32 %v1112_v54, %v1111_v55 }
 0xb82   : > { %v1114_v57 = vpack.c.bf16 %v1113_v56, %v1113_v56  ;;  %1118 = vst.msk [vmem:[#allocation2] sm:$0x3] %vm292_vm0, %v1113_v56 }
 0xb84   : > { %2110 = vst.msk [vmem:[%s2639_s4 + $0x7] sm:$0x1] %vm422_vm3, %v1114_v57 }
 0xb85 PF: > { %p2111_p6 = scmp.ne.s32.totalorder %s2557_s12, 1 }
 0xb86   : > { %v2807_v58 = vcombine.low (!%p2111_p6), %v2632_v1, %v2634_v2  ;;  %v2573_v59 = vmov (!%p2111_p6), 0.0   ;;  %vm2574_vm4 = vmmov (!%p2111_p6), 0   ;;  %v2815_v60 = vcombine.low (!%p2111_p6), %v2641_v3, %v2643_v4  ;;  %s2575_s7 = smov (!%p2111_p6), 64   ;;  %s2577_s8 = smov (!%p2111_p6), 96   ;;  %v2115_v18 = vld [vmem:[%s2630_s27 + $0x7] sm:$0x1] (!%p2111_p6) }
 0xb87   : > { %1122 = sbr.rel (%p2111_p6) target bundleno = 5880 (0x16f8), region = 44  ;;  %2283 = vmatprep.subr.bf16.mxu0 (!%p2111_p6), %v2573_v59  ;;  %2287 = vmatprep.mubr.msk.bf16.mxu0 (!%p2111_p6), %vm2574_vm4, %v2573_v59  ;;  %vm1137_vm5 = vcmask (!%p2111_p6), 261120   ;;  %v2576_v2 = vmov (!%p2111_p6), 1983009808   ;;  %v1201_v4 = vlaneseq (!%p2111_p6)  ;;  %v1183_v19 = vunpack.c.l.bf16 (!%p2111_p6), %v2115_v18  ;;  %v2116_v23 = vld [vmem:[%s2630_s27 + $0xf] sm:$0x1] (!%p2111_p6) }
 0xb88   : > { %2284 = vmatpush3.bf16.msra.mxu0 (!%p2111_p6), %v2807_v58  ;;  %1215 = vrot.lane.b32.xlu0 (!%p2111_p6), %v2645_v5, %s2575_s7  ;;  %v1199_v3 = vunpack.c.l.s4 (!%p2111_p6), %v2576_v2  ;;  %v1186_v25 = vunpack.c.l.bf16 (!%p2111_p6), %v2116_v23  ;;  %v2117_v7 = vld [vmem:[%s2630_s27 + $0x17] sm:$0x1] (!%p2111_p6)  ;;  %vm1239_vm6 = vcmask (!%p2111_p6), 253952   ;;  %v2122_v46 = vld [vmem:[%s2630_s27 + $0x6] sm:$0x1] (!%p2111_p6) }
 0xb89   : > { %v2817_v61 = vld [vmem:[#allocation2] sm:$0x3] (!%p2111_p6)  ;;  %2285 = vmatprep.subr.bf16.mxu0 (!%p2111_p6), %v2573_v59  ;;  %2291 = vmatprep.subr.bf16.mxu1 (!%p2111_p6), %v2573_v59  ;;  %v1202_v62 = vshrl.u32 (!%p2111_p6), %v1201_v4, 7  ;;  %v1189_v29 = vunpack.c.l.bf16 (!%p2111_p6), %v2117_v7  ;;  %v1286_v47 = vunpack.c.l.bf16 (!%p2111_p6), %v2122_v46  ;;  %v2123_v51 = vld [vmem:[%s2630_s27 + $0xe] sm:$0x1] (!%p2111_p6) }
 0xb8a   : > { %2292 = vmatpush3.bf16.msra.mxu1 (!%p2111_p6), %v2807_v58  ;;  %2295 = vmatprep.mubr.msk.bf16.mxu1 (!%p2111_p6), %vm2574_vm4, %v2573_v59  ;;  %v1124_v1 = vpack.c.bf16 (!%p2111_p6), %v2817_v61, %v2817_v61  ;;  %v1200_v5 = vunpack.c.0.s8 (!%p2111_p6), %v1199_v3  ;;  %v1289_v53 = vunpack.c.l.bf16 (!%p2111_p6), %v2123_v51  ;;  %v2124_v57 = vld [vmem:[%s2630_s27 + $0x16] sm:$0x1] (!%p2111_p6) }
 0xb8b   : > { %2293 = vmatprep.subr.bf16.mxu1 (!%p2111_p6), %v2573_v59  ;;  %v1292_v2 = vunpack.c.l.bf16 (!%p2111_p6), %v2124_v57 }
 0xb8c   : > { %2286 = vmatpush3.bf16.msra.mxu0 (!%p2111_p6), %v2815_v60  ;;  %v2840_v63 = vsub.s32 (!%p2111_p6), %v1200_v5, %v1202_v62 }
 0xb8d   : > { %2299 = vmatprep.subr.bf16.mxu0 (!%p2111_p6), %v2573_v59 }
 0xb8e   : > { %2294 = vmatpush3.bf16.msra.mxu1 %v2815_v60 }
 0xb8f   : > { %2288 = vmatmul.mubr.msk.bf16.vlgmr.msra.gmra.mrb[0].mxu0 %vm1137_vm5, %v1124_v1  ;;  %2307 = vmatprep.subr.bf16.mxu1 %v2573_v59 }
 0xb90   : > { %2300 = vmatpush3.bf16.msra.mxu0 %v2807_v58  ;;  %2303 = vmatprep.mubr.msk.bf16.mxu0 %vm2574_vm4, %v2573_v59 }
 0xb91   : > { %2301 = vmatprep.subr.bf16.mxu0 %v2573_v59 }
 0xb94   : > { %2302 = vmatpush3.bf16.msra.mxu0 %v2815_v60 }
 0xb95   : > { %2315 = vmatprep.subr.bf16.mxu0 %v2573_v59 }
 0xbfa   : > { %v2842_v0 = vpop.permute.xlu0 %1215 }
 0xc62   : > { %v1175_v9 = vpop.f32.mrb[0].mxu0 }
 0xc63   : > { %v1204_v10 = vrot.slane %v1175_v9, %v2840_v63  ;;  %v2289_v11 = vpop.f32.mrb[1].mxu0  ;;  %v1218_v12 = vadd.f32 %v2842_v0, %v1175_v9  ;;  %v1190_v20 = vadd.f32 %v1183_v19, %v1175_v9 }
 0xc64   : > { %v1178_v13 = vpop.f32.mrb[2].mxu0 }
 0xc65   : > { %1205 = vrot.lane.b32.xlu0 %v1204_v10, %s2577_s8  ;;  %v2290_v14 = vpop.f32.mrb[3].mxu0  ;;  %v1226_v15 = vrot.slane %v1218_v12, %v2840_v63  ;;  %v2118_v21 = vmul.f32 -1.442695, %v1190_v20 }
 0xc67   : > { %1227 = vrot.lane.b32.xlu1 %v1226_v15, %s2575_s7  ;;  %2463 = vpow2.f32 %v2118_v21 }
 0xc71   : > { %v2464_v22 = vpop.eup %2463 }
 0xc72   : > { %v1194_v24 = vadd.f32 1.0, %v2464_v22 }
 0xc74   : > { %2465 = vrcp.f32 %v1194_v24 }
 0xc7e   : > { %v2466_v8 = vpop.eup %2465 }
 0xcd7   : > { %v1206_v26 = vpop.permute.xlu0 %1205 }
 0xcd8   : > { %v1208_v6 = vadd.f32 %v1206_v26, %v1186_v25  ;;  %v2129_v25 = vld [vmem:[%s2630_s27 + $0x5] sm:$0x1] }
 0xcd9   : > { %v1228_v28 = vpop.permute.xlu1 %1227  ;;  %v1385_v26 = vunpack.c.l.bf16 %v2129_v25 }
 0xcda   : > { %v2119_v27 = vmul.f32 -1.442695, %v1208_v6  ;;  %v1230_v30 = vmul.f32 %v2466_v8, %v1228_v28  ;;  %v2130_v28 = vld [vmem:[%s2630_s27 + $0xd] sm:$0x1] }
 0xcdc   : > { %2467 = vpow2.f32 %v2119_v27  ;;  %v1231_v33 = vadd.f32 %v1230_v30, %v1189_v29  ;;  %v1388_v29 = vunpack.c.l.bf16 %v2130_v28 }
 0xce6   : > { %v2468_v31 = vpop.eup %2467 }
 0xce7   : > { %v1212_v32 = vadd.f32 1.0, %v2468_v31 }
 0xce9   : > { %2469 = vrcp.f32 %v1212_v32 }
 0xcea   : > { %2471 = vtanh.f32 %v1231_v33  ;;  %v2131_v33 = vld [vmem:[%s2630_s27 + $0x15] sm:$0x1] }
 0xcf3   : > { %v2470_v34 = vpop.eup %2469 }
 0xcf4   : > { %v1233_v35 = vsub.f32 1.0, %v2470_v34  ;;  %v2472_v36 = vpop.eup %2471  ;;  %v1235_v38 = vmul.f32 %v2470_v34, %v2817_v61 }
 0xcf6   : > { %v1234_v37 = vmul.f32 %v2472_v36, %v1233_v35  ;;  %v1391_v36 = vunpack.c.l.bf16 %v2131_v33 }
 0xcf8   : > { %v1236_v39 = vadd.f32 %v1235_v38, %v1234_v37 }
 0xcfa   : > { %v1237_v40 = vpack.c.bf16 %v1236_v39, %v1236_v39 }
 0xcfc   : > { %2120 = vst.msk [vmem:[%s2639_s4 + $0x7] sm:$0x1] %vm1239_vm6, %v1237_v40  ;;  %2296 = vmatmul.mubr.msk.bf16.vlgmr.msra.gmra.mrb[0].mxu1 %vm1137_vm5, %v1237_v40 }
 0xcfd   : > { %2308 = vmatpush3.bf16.msra.mxu1 %v2807_v58  ;;  %2311 = vmatprep.mubr.msk.bf16.mxu1 %vm2574_vm4, %v2573_v59 }
 0xcfe   : > { %2309 = vmatprep.subr.bf16.mxu1 %v2573_v59 }
 0xd01   : > { %2310 = vmatpush3.bf16.msra.mxu1 %v2815_v60 }
 0xd02   : > { %2323 = vmatprep.subr.bf16.mxu1 %v2573_v59 }
 0xdcf   : > { %v1278_v41 = vpop.f32.mrb[0].mxu1 }
 0xdd0   : > { %v1307_v17 = vrot.slane %v1278_v41, %v2840_v63  ;;  %v1318_v42 = vadd.f32 %v1278_v41, %v2842_v0  ;;  %v2297_v43 = vpop.f32.mrb[1].mxu1  ;;  %v1293_v48 = vadd.f32 %v1286_v47, %v1278_v41 }
 0xdd1   : > { %v1281_v44 = vpop.f32.mrb[2].mxu1 }
 0xdd2   : > { %1308 = vrot.lane.b32.xlu1 %v1307_v17, %s2577_s8  ;;  %v2298_v45 = vpop.f32.mrb[3].mxu1  ;;  %v1326_v16 = vrot.slane %v1318_v42, %v2840_v63  ;;  %v2125_v49 = vmul.f32 -1.442695, %v1293_v48 }
 0xdd4   : > { %1327 = vrot.lane.b32.xlu0 %v1326_v16, %s2575_s7  ;;  %2473 = vpow2.f32 %v2125_v49 }
 0xdde   : > { %v2474_v50 = vpop.eup %2473 }
 0xddf   : > { %v1297_v52 = vadd.f32 1.0, %v2474_v50 }
 0xde1   : > { %2475 = vrcp.f32 %v1297_v52 }
 0xdeb   : > { %v2476_v1 = vpop.eup %2475 }
 0xe44   : > { %v1309_v54 = vpop.permute.xlu1 %1308 }
 0xe45   : > { %v1311_v55 = vadd.f32 %v1309_v54, %v1289_v53  ;;  %v2136_v53 = vld [vmem:[%s2630_s27 + $0x4] sm:$0x1] }
 0xe46   : > { %v1328_v61 = vpop.permute.xlu0 %1327  ;;  %v1484_v54 = vunpack.c.l.bf16 %v2136_v53 }
 0xe47   : > { %v2126_v56 = vmul.f32 -1.442695, %v1311_v55  ;;  %v1330_v3 = vmul.f32 %v2476_v1, %v1328_v61  ;;  %v2137_v61 = vld [vmem:[%s2630_s27 + $0xc] sm:$0x1] }
 0xe49   : > { %2477 = vpow2.f32 %v2126_v56  ;;  %v1331_v62 = vadd.f32 %v1330_v3, %v1292_v2  ;;  %v1487_v2 = vunpack.c.l.bf16 %v2137_v61 }
 0xe53   : > { %v2478_v4 = vpop.eup %2477 }
 0xe54   : > { %v1315_v5 = vadd.f32 1.0, %v2478_v4 }
 0xe56   : > { %2479 = vrcp.f32 %v1315_v5 }
 0xe57   : > { %2481 = vtanh.f32 %v1331_v62  ;;  %v2138_v62 = vld [vmem:[%s2630_s27 + $0x14] sm:$0x1] }
 0xe60   : > { %v2480_v9 = vpop.eup %2479 }
 0xe61   : > { %v1333_v10 = vsub.f32 1.0, %v2480_v9  ;;  %v2482_v11 = vpop.eup %2481  ;;  %v1335_v12 = vmul.f32 %v2480_v9, %v1236_v39 }
 0xe63   : > { %v1334_v13 = vmul.f32 %v2482_v11, %v1333_v10  ;;  %v1490_v11 = vunpack.c.l.bf16 %v2138_v62 }
 0xe65   : > { %v1336_v14 = vadd.f32 %v1335_v12, %v1334_v13 }
 0xe67   : > { %v1337_v15 = vpack.c.bf16 %v1336_v14, %v1336_v14 }
 0xe69   : > { %2127 = vst.msk [vmem:[%s2639_s4 + $0x6] sm:$0x1] %vm1239_vm6, %v1337_v15  ;;  %2304 = vmatmul.mubr.msk.bf16.vlgmr.msra.gmra.mrb[4].mxu0 %vm1137_vm5, %v1337_v15 }
 0xe6a   : > { %2316 = vmatpush3.bf16.msra.mxu0 %v2807_v58  ;;  %2319 = vmatprep.mubr.msk.bf16.mxu0 %vm2574_vm4, %v2573_v59 }
 0xe6b   : > { %2317 = vmatprep.subr.bf16.mxu0 %v2573_v59 }
 0xe6e   : > { %2318 = vmatpush3.bf16.msra.mxu0 %v2815_v60 }
 0xe6f   : > { %2331 = vmatprep.subr.bf16.mxu0 %v2573_v59 }
 0xf3c   : > { %v1377_v18 = vpop.f32.mrb[4].mxu0 }
 0xf3d   : > { %v1406_v19 = vrot.slane %v1377_v18, %v2840_v63  ;;  %v1417_v20 = vadd.f32 %v1377_v18, %v2842_v0  ;;  %v2305_v21 = vpop.f32.mrb[5].mxu0  ;;  %v1392_v6 = vadd.f32 %v1385_v26, %v1377_v18 }
 0xf3e   : > { %v1380_v22 = vpop.f32.mrb[6].mxu0 }
 0xf3f   : > { %1407 = vrot.lane.b32.xlu1 %v1406_v19, %s2577_s8  ;;  %v2306_v23 = vpop.f32.mrb[7].mxu0  ;;  %v1425_v24 = vrot.slane %v1417_v20, %v2840_v63  ;;  %v2132_v27 = vmul.f32 -1.442695, %v1392_v6 }
 0xf41   : > { %1426 = vrot.lane.b32.xlu0 %v1425_v24, %s2575_s7  ;;  %2483 = vpow2.f32 %v2132_v27 }
 0xf4b   : > { %v2484_v7 = vpop.eup %2483 }
 0xf4c   : > { %v1396_v8 = vadd.f32 1.0, %v2484_v7 }
 0xf4e   : > { %2485 = vrcp.f32 %v1396_v8 }
 0xf58   : > { %v2486_v35 = vpop.eup %2485 }
 0xfb1   : > { %v1408_v30 = vpop.permute.xlu1 %1407 }
 0xfb2   : > { %v1410_v31 = vadd.f32 %v1408_v30, %v1388_v29  ;;  %v2143_v29 = vld [vmem:[%s2630_s27 + $0x3] sm:$0x1] }
 0xfb3   : > { %v1427_v34 = vpop.permute.xlu0 %1426  ;;  %v1583_v30 = vunpack.c.l.bf16 %v2143_v29 }
 0xfb4   : > { %v2133_v32 = vmul.f32 -1.442695, %v1410_v31  ;;  %v1429_v37 = vmul.f32 %v2486_v35, %v1427_v34  ;;  %v2144_v34 = vld [vmem:[%s2630_s27 + $0xb] sm:$0x1] }
 0xfb6   : > { %2487 = vpow2.f32 %v2133_v32  ;;  %v1430_v40 = vadd.f32 %v1429_v37, %v1391_v36  ;;  %v1586_v36 = vunpack.c.l.bf16 %v2144_v34 }
 0xfc0   : > { %v2488_v38 = vpop.eup %2487 }
 0xfc1   : > { %v1414_v39 = vadd.f32 1.0, %v2488_v38 }
 0xfc3   : > { %2489 = vrcp.f32 %v1414_v39 }
 0xfc4   : > { %2491 = vtanh.f32 %v1430_v40  ;;  %v2145_v40 = vld [vmem:[%s2630_s27 + $0x13] sm:$0x1] }
 0xfcd   : > { %v2490_v41 = vpop.eup %2489 }
 0xfce   : > { %v1432_v17 = vsub.f32 1.0, %v2490_v41  ;;  %v2492_v42 = vpop.eup %2491  ;;  %v1434_v43 = vmul.f32 %v2490_v41, %v1336_v14 }
 0xfd0   : > { %v1433_v44 = vmul.f32 %v2492_v42, %v1432_v17  ;;  %v1589_v42 = vunpack.c.l.bf16 %v2145_v40 }
 0xfd2   : > { %v1435_v45 = vadd.f32 %v1434_v43, %v1433_v44 }
 0xfd4   : > { %v1436_v16 = vpack.c.bf16 %v1435_v45, %v1435_v45 }
 0xfd6   : > { %2134 = vst.msk [vmem:[%s2639_s4 + $0x5] sm:$0x1] %vm1239_vm6, %v1436_v16  ;;  %2312 = vmatmul.mubr.msk.bf16.vlgmr.msra.gmra.mrb[4].mxu1 %vm1137_vm5, %v1436_v16 }
 0xfd7   : > { %2324 = vmatpush3.bf16.msra.mxu1 %v2807_v58  ;;  %2327 = vmatprep.mubr.msk.bf16.mxu1 %vm2574_vm4, %v2573_v59 }
 0xfd8   : > { %2325 = vmatprep.subr.bf16.mxu1 %v2573_v59 }
 0xfdb   : > { %2326 = vmatpush3.bf16.msra.mxu1 %v2815_v60 }
 0xfdc   : > { %2339 = vmatprep.subr.bf16.mxu1 %v2573_v59 }
0x10a9   : > { %v1476_v46 = vpop.f32.mrb[4].mxu1 }
0x10aa   : > { %v1505_v47 = vrot.slane %v1476_v46, %v2840_v63  ;;  %v1516_v48 = vadd.f32 %v1476_v46, %v2842_v0  ;;  %v2313_v49 = vpop.f32.mrb[5].mxu1  ;;  %v1491_v55 = vadd.f32 %v1484_v54, %v1476_v46 }
0x10ab   : > { %v1479_v50 = vpop.f32.mrb[6].mxu1 }
0x10ac   : > { %1506 = vrot.lane.b32.xlu1 %v1505_v47, %s2577_s8  ;;  %v2314_v51 = vpop.f32.mrb[7].mxu1  ;;  %v1524_v52 = vrot.slane %v1516_v48, %v2840_v63  ;;  %v2139_v56 = vmul.f32 -1.442695, %v1491_v55 }
0x10ae   : > { %1525 = vrot.lane.b32.xlu0 %v1524_v52, %s2575_s7  ;;  %2493 = vpow2.f32 %v2139_v56 }
0x10b8   : > { %v2494_v57 = vpop.eup %2493 }
0x10b9   : > { %v1495_v1 = vadd.f32 1.0, %v2494_v57 }
0x10bb   : > { %2495 = vrcp.f32 %v1495_v1  ;;  %v2150_v1 = vld [vmem:[%s2630_s27 + $0x2] sm:$0x1] }
0x10c5   : > { %v2496_v10 = vpop.eup %2495 }
0x111e   : > { %v1507_v3 = vpop.permute.xlu1 %1506 }
0x111f   : > { %v1509_v4 = vadd.f32 %v1507_v3, %v1487_v2 }
0x1120   : > { %v1526_v9 = vpop.permute.xlu0 %1525 }
0x1121   : > { %v2140_v5 = vmul.f32 -1.442695, %v1509_v4  ;;  %v1528_v12 = vmul.f32 %v2496_v10, %v1526_v9  ;;  %v2151_v4 = vld [vmem:[%s2630_s27 + $0xa] sm:$0x1] }
0x1122   : > { %v1685_v62 = vunpack.c.l.bf16 %v2151_v4 }
0x1123   : > { %2497 = vpow2.f32 %v2140_v5  ;;  %v1529_v15 = vadd.f32 %v1528_v12, %v1490_v11  ;;  %v2152_v12 = vld [vmem:[%s2630_s27 + $0x12] sm:$0x1] }
0x112d   : > { %v2498_v13 = vpop.eup %2497 }
0x112e   : > { %v1513_v14 = vadd.f32 1.0, %v2498_v13 }
0x1130   : > { %2499 = vrcp.f32 %v1513_v14 }
0x1131   : > { %2501 = vtanh.f32 %v1529_v15  ;;  %v1688_v15 = vunpack.c.l.bf16 %v2152_v12 }
0x113a   : > { %v2500_v18 = vpop.eup %2499 }
0x113b   : > { %v1531_v19 = vsub.f32 1.0, %v2500_v18  ;;  %v2502_v20 = vpop.eup %2501  ;;  %v1533_v21 = vmul.f32 %v2500_v18, %v1435_v45 }
0x113d   : > { %v1532_v22 = vmul.f32 %v2502_v20, %v1531_v19 }
0x113f   : > { %v1534_v23 = vadd.f32 %v1533_v21, %v1532_v22 }
0x1141   : > { %v1535_v24 = vpack.c.bf16 %v1534_v23, %v1534_v23 }
0x1143   : > { %2141 = vst.msk [vmem:[%s2639_s4 + $0x4] sm:$0x1] %vm1239_vm6, %v1535_v24  ;;  %2320 = vmatmul.mubr.msk.bf16.vlgmr.msra.gmra.mrb[8].mxu0 %vm1137_vm5, %v1535_v24 }
0x1144   : > { %2332 = vmatpush3.bf16.msra.mxu0 %v2807_v58  ;;  %2335 = vmatprep.mubr.msk.bf16.mxu0 %vm2574_vm4, %v2573_v59 }
0x1145   : > { %2333 = vmatprep.subr.bf16.mxu0 %v2573_v59 }
0x1148   : > { %2334 = vmatpush3.bf16.msra.mxu0 %v2815_v60 }
0x1216   : > { %v1575_v25 = vpop.f32.mrb[8].mxu0 }
0x1217   : > { %v1604_v26 = vrot.slane %v1575_v25, %v2840_v63  ;;  %v1615_v6 = vadd.f32 %v1575_v25, %v2842_v0  ;;  %v2321_v27 = vpop.f32.mrb[9].mxu0  ;;  %v1590_v31 = vadd.f32 %v1583_v30, %v1575_v25 }
0x1218   : > { %v1578_v7 = vpop.f32.mrb[10].mxu0 }
0x1219   : > { %1605 = vrot.lane.b32.xlu1 %v1604_v26, %s2577_s8  ;;  %v2322_v28 = vpop.f32.mrb[11].mxu0  ;;  %v1623_v8 = vrot.slane %v1615_v6, %v2840_v63  ;;  %v2146_v32 = vmul.f32 -1.442695, %v1590_v31 }
0x121b   : > { %1624 = vrot.lane.b32.xlu0 %v1623_v8, %s2575_s7  ;;  %2503 = vpow2.f32 %v2146_v32 }
0x1225   : > { %v2504_v33 = vpop.eup %2503 }
0x1226   : > { %v1594_v35 = vadd.f32 1.0, %v2504_v33  ;;  %v2157_v33 = vld [vmem:[%s2630_s27 + $0x1] sm:$0x1] }
0x1227   : > { %v1781_v34 = vunpack.c.l.bf16 %v2157_v33 }
0x1228   : > { %2505 = vrcp.f32 %v1594_v35 }
0x1232   : > { %v2506_v17 = vpop.eup %2505 }
0x128b   : > { %v1606_v37 = vpop.permute.xlu1 %1605 }
0x128c   : > { %v1608_v38 = vadd.f32 %v1606_v37, %v1586_v36 }
0x128d   : > { %v1625_v41 = vpop.permute.xlu0 %1624 }
0x128e   : > { %v2147_v39 = vmul.f32 -1.442695, %v1608_v38  ;;  %v1627_v43 = vmul.f32 %v2506_v17, %v1625_v41  ;;  %v2158_v38 = vld [vmem:[%s2630_s27 + $0x9] sm:$0x1] }
0x128f   : > { %v1784_v40 = vunpack.c.l.bf16 %v2158_v38 }
0x1290   : > { %2507 = vpow2.f32 %v2147_v39  ;;  %v1628_v16 = vadd.f32 %v1627_v43, %v1589_v42  ;;  %v2159_v43 = vld [vmem:[%s2630_s27 + $0x11] sm:$0x1] }
0x129a   : > { %v2508_v44 = vpop.eup %2507 }
0x129b   : > { %v1612_v45 = vadd.f32 1.0, %v2508_v44 }
0x129d   : > { %2509 = vrcp.f32 %v1612_v45 }
0x129e   : > { %2511 = vtanh.f32 %v1628_v16  ;;  %v1787_v16 = vunpack.c.l.bf16 %v2159_v43 }
0x12a7   : > { %v2510_v46 = vpop.eup %2509 }
0x12a8   : > { %v1630_v47 = vsub.f32 1.0, %v2510_v46  ;;  %v2512_v48 = vpop.eup %2511  ;;  %v1632_v49 = vmul.f32 %v2510_v46, %v1534_v23 }
0x12aa   : > { %v1631_v50 = vmul.f32 %v2512_v48, %v1630_v47 }
0x12ac   : > { %v1633_v51 = vadd.f32 %v1632_v49, %v1631_v50 }
0x12ae   : > { %v1634_v52 = vpack.c.bf16 %v1633_v51, %v1633_v51 }
0x12b0   : > { %2148 = vst.msk [vmem:[%s2639_s4 + $0x3] sm:$0x1] %vm1239_vm6, %v1634_v52  ;;  %2328 = vmatmul.mubr.msk.bf16.vlgmr.msra.gmra.mrb[8].mxu1 %vm1137_vm5, %v1634_v52 }
0x12b1   : > { %2340 = vmatpush3.bf16.msra.mxu1 %v2807_v58  ;;  %2343 = vmatprep.mubr.msk.bf16.mxu1 %vm2574_vm4, %v2573_v59 }
0x12b2   : > { %2341 = vmatprep.subr.bf16.mxu1 %v2573_v59  ;;  %v1682_v59 = vunpack.c.l.bf16 %v2150_v1 }
0x12b5   : > { %2342 = vmatpush3.bf16.msra.mxu1 %v2815_v60 }
0x1383   : > { %v1674_v53 = vpop.f32.mrb[8].mxu1 }
0x1384   : > { %v1703_v54 = vrot.slane %v1674_v53, %v2840_v63  ;;  %v1714_v55 = vadd.f32 %v1674_v53, %v2842_v0  ;;  %v2329_v56 = vpop.f32.mrb[9].mxu1  ;;  %v1689_v2 = vadd.f32 %v1682_v59, %v1674_v53 }
0x1385   : > { %v1677_v57 = vpop.f32.mrb[10].mxu1 }
0x1386   : > { %1704 = vrot.lane.b32.xlu1 %v1703_v54, %s2577_s8  ;;  %v2330_v61 = vpop.f32.mrb[11].mxu1  ;;  %v1722_v58 = vrot.slane %v1714_v55, %v2840_v63  ;;  %v2153_v60 = vmul.f32 -1.442695, %v1689_v2 }
0x1388   : > { %1723 = vrot.lane.b32.xlu0 %v1722_v58, %s2575_s7  ;;  %2513 = vpow2.f32 %v2153_v60 }
0x1392   : > { %v2514_v3 = vpop.eup %2513 }
0x1393   : > { %v1693_v5 = vadd.f32 1.0, %v2514_v3  ;;  %v1878_v3 = vld [vmem:[%s2630_s27] sm:$0x1] }
0x1394   : > { %v1879_v4 = vunpack.c.l.bf16 %v1878_v3 }
0x1395   : > { %2515 = vrcp.f32 %v1693_v5 }
0x139f   : > { %v2516_v14 = vpop.eup %2515 }
0x13f8   : > { %v1705_v9 = vpop.permute.xlu1 %1704 }
0x13f9   : > { %v1707_v10 = vadd.f32 %v1705_v9, %v1685_v62 }
0x13fa   : > { %v1724_v13 = vpop.permute.xlu0 %1723 }
0x13fb   : > { %v2154_v11 = vmul.f32 -1.442695, %v1707_v10  ;;  %v1726_v18 = vmul.f32 %v2516_v14, %v1724_v13  ;;  %v2164_v10 = vld [vmem:[%s2630_s27 + $0x8] sm:$0x1] }
0x13fc   : > { %v1882_v12 = vunpack.c.l.bf16 %v2164_v10 }
0x13fd   : > { %2517 = vpow2.f32 %v2154_v11  ;;  %v1727_v21 = vadd.f32 %v1726_v18, %v1688_v15  ;;  %v2165_v15 = vld [vmem:[%s2630_s27 + $0x10] sm:$0x1] }
0x1407   : > { %v2518_v19 = vpop.eup %2517 }
0x1408   : > { %v1711_v20 = vadd.f32 1.0, %v2518_v19  ;;  %v1885_v19 = vunpack.c.l.bf16 %v2165_v15 }
0x140a   : > { %2519 = vrcp.f32 %v1711_v20 }
0x140b   : > { %2521 = vtanh.f32 %v1727_v21 }
0x1414   : > { %v2520_v22 = vpop.eup %2519 }
0x1415   : > { %v1729_v23 = vsub.f32 1.0, %v2520_v22  ;;  %v2522_v24 = vpop.eup %2521  ;;  %v1731_v25 = vmul.f32 %v2520_v22, %v1633_v51 }
0x1417   : > { %v1730_v26 = vmul.f32 %v2522_v24, %v1729_v23 }
0x1419   : > { %v1732_v6 = vadd.f32 %v1731_v25, %v1730_v26 }
0x141b   : > { %v1733_v27 = vpack.c.bf16 %v1732_v6, %v1732_v6 }
0x141d   : > { %2155 = vst.msk [vmem:[%s2639_s4 + $0x2] sm:$0x1] %vm1239_vm6, %v1733_v27  ;;  %2336 = vmatmul.mubr.msk.bf16.vlgmr.msra.gmra.mrb[12].mxu0 %vm1137_vm5, %v1733_v27 }
0x14f0   : > { %v1773_v7 = vpop.f32.mrb[12].mxu0 }
0x14f1   : > { %v1802_v28 = vrot.slane %v1773_v7, %v2840_v63  ;;  %v1813_v8 = vadd.f32 %v1773_v7, %v2842_v0  ;;  %v2337_v29 = vpop.f32.mrb[13].mxu0  ;;  %v1788_v35 = vadd.f32 %v1781_v34, %v1773_v7 }
0x14f2   : > { %v1776_v30 = vpop.f32.mrb[14].mxu0 }
0x14f3   : > { %1803 = vrot.lane.b32.xlu1 %v1802_v28, %s2577_s8  ;;  %v2338_v31 = vpop.f32.mrb[15].mxu0  ;;  %v1821_v32 = vrot.slane %v1813_v8, %v2840_v63  ;;  %v2160_v36 = vmul.f32 -1.442695, %v1788_v35 }
0x14f5   : > { %1822 = vrot.lane.b32.xlu0 %v1821_v32, %s2575_s7  ;;  %2523 = vpow2.f32 %v2160_v36 }
0x14ff   : > { %v2524_v37 = vpop.eup %2523 }
0x1500   : > { %v1792_v39 = vadd.f32 1.0, %v2524_v37 }
0x1502   : > { %2525 = vrcp.f32 %v1792_v39 }
0x150c   : > { %v2526_v45 = vpop.eup %2525 }
0x1565   : > { %v1804_v41 = vpop.permute.xlu1 %1803 }
0x1566   : > { %v1806_v17 = vadd.f32 %v1804_v41, %v1784_v40 }
0x1567   : > { %v1823_v44 = vpop.permute.xlu0 %1822 }
0x1568   : > { %v2161_v42 = vmul.f32 -1.442695, %v1806_v17  ;;  %v1825_v46 = vmul.f32 %v2526_v45, %v1823_v44 }
0x156a   : > { %2527 = vpow2.f32 %v2161_v42  ;;  %v1826_v49 = vadd.f32 %v1825_v46, %v1787_v16 }
0x1574   : > { %v2528_v47 = vpop.eup %2527 }
0x1575   : > { %v1810_v48 = vadd.f32 1.0, %v2528_v47 }
0x1577   : > { %2529 = vrcp.f32 %v1810_v48 }
0x1578   : > { %2531 = vtanh.f32 %v1826_v49 }
0x1581   : > { %v2530_v50 = vpop.eup %2529 }
0x1582   : > { %v1828_v51 = vsub.f32 1.0, %v2530_v50  ;;  %v2532_v52 = vpop.eup %2531  ;;  %v1830_v53 = vmul.f32 %v2530_v50, %v1732_v6 }
0x1584   : > { %v1829_v54 = vmul.f32 %v2532_v52, %v1828_v51 }
0x1586   : > { %v1831_v55 = vadd.f32 %v1830_v53, %v1829_v54 }
0x1588   : > { %v1832_v56 = vpack.c.bf16 %v1831_v55, %v1831_v55 }
0x158a   : > { %2162 = vst.msk [vmem:[%s2639_s4 + $0x1] sm:$0x1] %vm1239_vm6, %v1832_v56  ;;  %2344 = vmatmul.mubr.msk.bf16.vlgmr.msra.gmra.mrb[12].mxu1 %vm1137_vm5, %v1832_v56 }
0x165d   : > { %v1872_v57 = vpop.f32.mrb[12].mxu1 }
0x165e   : > { %v1900_v61 = vrot.slane %v1872_v57, %v2840_v63  ;;  %v1911_v58 = vadd.f32 %v1872_v57, %v2842_v0  ;;  %v2345_v1 = vpop.f32.mrb[13].mxu1  ;;  %v1886_v5 = vadd.f32 %v1879_v4, %v1872_v57 }
0x165f   : > { %v1875_v59 = vpop.f32.mrb[14].mxu1 }
0x1660   : > { %1901 = vrot.lane.b32.xlu1 %v1900_v61, %s2577_s8  ;;  %v2346_v2 = vpop.f32.mrb[15].mxu1  ;;  %v1919_v60 = vrot.slane %v1911_v58, %v2840_v63  ;;  %v2166_v62 = vmul.f32 -1.442695, %v1886_v5 }
0x1662   : > { %1920 = vrot.lane.b32.xlu0 %v1919_v60, %s2575_s7  ;;  %2533 = vpow2.f32 %v2166_v62 }
0x166c   : > { %v2534_v9 = vpop.eup %2533 }
0x166d   : > { %v1890_v11 = vadd.f32 1.0, %v2534_v9 }
0x166f   : > { %2535 = vrcp.f32 %v1890_v11 }
0x1679   : > { %v2536_v63 = vpop.eup %2535 }
0x16d2   : > { %v1902_v0 = vpop.permute.xlu1 %1901 }
0x16d3   : > { %v1904_v13 = vadd.f32 %v1902_v0, %v1882_v12 }
0x16d4   : > { %v1921_v18 = vpop.permute.xlu0 %1920 }
0x16d5   : > { %v2167_v14 = vmul.f32 -1.442695, %v1904_v13  ;;  %v1923_v20 = vmul.f32 %v2536_v63, %v1921_v18 }
0x16d7   : > { %2537 = vpow2.f32 %v2167_v14  ;;  %v1924_v23 = vadd.f32 %v1923_v20, %v1885_v19 }
0x16e1   : > { %v2538_v21 = vpop.eup %2537 }
0x16e2   : > { %v1908_v22 = vadd.f32 1.0, %v2538_v21 }
0x16e4   : > { %2539 = vrcp.f32 %v1908_v22 }
0x16e5   : > { %2541 = vtanh.f32 %v1924_v23 }
0x16ee   : > { %v2540_v24 = vpop.eup %2539 }
0x16ef   : > { %v1926_v25 = vsub.f32 1.0, %v2540_v24  ;;  %v2542_v26 = vpop.eup %2541  ;;  %v1928_v6 = vmul.f32 %v2540_v24, %v1831_v55 }
0x16f1   : > { %v1927_v27 = vmul.f32 %v2542_v26, %v1926_v25 }
0x16f3   : > { %v1929_v7 = vadd.f32 %v1928_v6, %v1927_v27 }
0x16f5   : > { %v1930_v28 = vpack.c.bf16 %v1929_v7, %v1929_v7  ;;  %1933 = vst.msk [vmem:[#allocation2] sm:$0x3] %vm292_vm0, %v1929_v7 }
0x16f7   : > { %1931 = vst.msk [vmem:[%s2639_s4] sm:$0x1] %vm1239_vm6, %v1930_v28 }
0x16f8 PF: > { %s13_s14 = sadd.s32 1, %s2565_s14   ;;  %s2974_s12 = smov %s2561_s13 }
0x16f9   : > { %p10_p7 = scmp.ge.s32.totalorder %s13_s14, 4   ;;  %s2975_s13 = smov %s2977_s15 }
0x16fb   :  { %12 = sbr.rel (!%p10_p7) target bundleno = 2 (0x2), region = 140 }

</bundles_post_ra>
